<compile_context>
chip_gen: v6e
topology: v6e:2x2x1
jax: 0.10.0
libtpu: 0.0.40
codegen_flags: <defaults>
</compile_context>

<pallas_src>
import functools

import jax
import jax.numpy as jnp
from jax.experimental import pallas as pl
from jax.experimental.pallas import tpu as pltpu


def _round_up(n, m):
    return ((n + m - 1) // m) * m


def autoencoder_kernel(x_ref,
                       w1, b1, w2, b2, w3, b3,      # encoder params (bf16 W, f32 b)
                       w4, b4, w5, b5, w6, b6,      # decoder params
                       enc_ref, dec_ref):
    f32, bf16 = jnp.float32, jnp.bfloat16
    # x streams from HBM as f32; the bf16 cast is a free VPU op (no separate
    # host-side astype pass over HBM).
    x = x_ref[...].astype(bf16)                      # (TB, in)

    # ---- encoder: Linear(in,128) -> ReLU -> Linear(128,64) -> ReLU -> Linear(64,CP)
    h = jnp.dot(x, w1[...], preferred_element_type=f32) + b1[...]
    h = jnp.maximum(h, 0.0)
    h = jnp.dot(h.astype(bf16), w2[...], preferred_element_type=f32) + b2[...]
    h = jnp.maximum(h, 0.0)
    z = jnp.dot(h.astype(bf16), w3[...], preferred_element_type=f32) + b3[...]
    # Store only the real bottleneck columns (padded columns of z are exactly
    # zero).  enc is a minor stream, so the masked (<128-lane) store is cheap
    # and we avoid the padded writeback + host-side slice re-read entirely.
    enc_ref[...] = z[:, :enc_ref.shape[-1]].astype(enc_ref.dtype)

    # ---- decoder: Linear(CP,64) -> ReLU -> Linear(64,128) -> ReLU -> Linear(128,in) -> Tanh
    # (padded z columns are 0 and w4's padded rows are 0 -> identical math.)
    d = jnp.dot(z.astype(bf16), w4[...], preferred_element_type=f32) + b4[...]
    d = jnp.maximum(d, 0.0)
    d = jnp.dot(d.astype(bf16), w5[...], preferred_element_type=f32) + b5[...]
    d = jnp.maximum(d, 0.0)
    d = jnp.dot(d.astype(bf16), w6[...], preferred_element_type=f32) + b6[...]
    # tanh in bf16 (EUP bf16 path on v6e/v7x; output in [-1,1]) and store bf16:
    # dec writeback is the largest HBM stream, bf16 halves it.
    dec_ref[...] = jnp.tanh(d.astype(bf16)).astype(dec_ref.dtype)


def prepare_params(params):
    """One-time, out-of-jit param conversion.

    W -> bf16 stored (in, out); b -> f32 (1, out); the compress bottleneck is
    zero-padded to a multiple of 128 lanes (w3/b3 columns, w4 rows), which
    keeps the padded math exact.  Returns (flat_param_tuple, compress).
    """
    w1, b1, w2, b2, w3, b3, w4, b4, w5, b5, w6, b6 = params
    compress = w3.shape[1]
    cp = _round_up(compress, 128)
    pad_c = cp - compress
    w3p = jnp.pad(w3, ((0, 0), (0, pad_c)))
    b3p = jnp.pad(b3, ((0, 0), (0, pad_c)))
    w4p = jnp.pad(w4, ((0, pad_c), (0, 0)))

    weights = [w.astype(jnp.bfloat16) for w in (w1, w2, w3p, w4p, w5, w6)]
    biases = [b.astype(jnp.float32).reshape(1, -1)
              for b in (b1, b2, b3p, b4, b5, b6)]
    flat = []
    for w, b in zip(weights, biases):
        flat.extend([w, b])
    return tuple(flat), compress


def autoencoder_forward(x, prepared_params, *, compress,
                        batch_tile=512, dec_dtype=jnp.bfloat16):
    """Full autoencoder forward in one Pallas kernel.

    Returns (x_encoder (B, compress) f32, x_decoder (B, input_size) dec_dtype),
    matching the PyTorch module's forward (dec_dtype=bf16 is a deliberate
    traffic optimization; pass jnp.float32 for exact-dtype parity).
    """
    B, input_size = x.shape

    # Batch tile: 512 rows (multiple of the bf16 sublane tile of 16) amortizes
    # the ~0.35 us per-grid-step overhead; shrink only to keep >=4 grid steps
    # so v7x megacore + double buffering still overlap the x DMA with compute.
    if B <= batch_tile:
        TB = B
    else:
        TB = batch_tile
        while TB > 128 and pl.cdiv(B, TB) < 4:
            TB //= 2
    grid = (pl.cdiv(B, TB),)

    batch_map = lambda i: (i, 0)
    const_map = lambda i: (0, 0)
    resident = lambda a: pl.BlockSpec(a.shape, const_map)  # DMA'd once, VMEM-resident

    in_specs = [pl.BlockSpec((TB, input_size), batch_map)]
    in_specs += [resident(p) for p in prepared_params]

    out_specs = (pl.BlockSpec((TB, compress), batch_map),
                 pl.BlockSpec((TB, input_size), batch_map))
    out_shape = (jax.ShapeDtypeStruct((B, compress), jnp.float32),
                 jax.ShapeDtypeStruct((B, input_size), dec_dtype))

    # VMEM @ TB=512, input_size~784: x f32 1.6 MiB + dec bf16 0.8 MiB +
    # enc 64 KiB, each double-buffered, + ~1 MiB resident bf16 weights +
    # f32 intermediates -> comfortably under 32 MiB on v5e/v6e/v7x.
    # v5e's *default* scoped VMEM is only 16 MiB, so raise the limit.
    return pl.pallas_call(
        autoencoder_kernel,
        grid=grid,
        in_specs=in_specs,
        out_specs=out_specs,
        out_shape=out_shape,
        compiler_params=pltpu.CompilerParams(
            dimension_semantics=("parallel",),   # megacore split on v7x
            vmem_limit_bytes=32 << 20),
    )(x, *prepared_params)


def init_linear(key, fan_in, fan_out):
    """PyTorch nn.Linear default init: U(-1/sqrt(fan_in), 1/sqrt(fan_in))."""
    kw, kb = jax.random.split(key)
    bound = 1.0 / jnp.sqrt(float(fan_in))
    # stored transposed relative to PyTorch: (in, out)
    w = jax.random.uniform(kw, (fan_in, fan_out), jnp.float32, -bound, bound)
    b = jax.random.uniform(kb, (1, fan_out), jnp.float32, -bound, bound)
    return w, b


def make_params(key, input_size, compress_total):
    dims = [(input_size, 128), (128, 64), (64, compress_total),   # encoder
            (compress_total, 64), (64, 128), (128, input_size)]   # decoder
    keys = jax.random.split(key, len(dims))
    params = []
    for k, (fi, fo) in zip(keys, dims):
        params.extend(init_linear(k, fi, fo))
    return params  # [w1, b1, w2, b2, ..., w6, b6]


def autoencoder_reference(x, params):
    """Pure-JAX reference with bf16-operand / f32-accumulate matmul numerics
    (tanh kept in f32; the kernel's bf16 tanh/store is covered by tolerance)."""
    w1, b1, w2, b2, w3, b3, w4, b4, w5, b5, w6, b6 = params
    bf = lambda a: a.astype(jnp.bfloat16).astype(jnp.float32)
    mm = functools.partial(jnp.dot, precision=jax.lax.Precision.HIGHEST)
    h = jnp.maximum(mm(bf(x), bf(w1)) + b1, 0.0)
    h = jnp.maximum(mm(bf(h), bf(w2)) + b2, 0.0)
    z = mm(bf(h), bf(w3)) + b3
    d = jnp.maximum(mm(bf(z), bf(w4)) + b4, 0.0)
    d = jnp.maximum(mm(bf(d), bf(w5)) + b5, 0.0)
    d = jnp.tanh(mm(bf(d), bf(w6)) + b6)
    return z, d


if __name__ == "__main__":
    key = jax.random.PRNGKey(0)
    k_x, k_p = jax.random.split(key)

    batch = 1024               # 4 batch tiles of 256 -> exercises the grid pipeline
    input_size = 256           # small stand-in for MNIST's 784
    compress_total = 32

    x = jax.random.normal(k_x, (batch, input_size), jnp.float32)
    params = make_params(k_p, input_size, compress_total)
    prepared, compress = prepare_params(params)    # one-time, outside jit

    fwd = jax.jit(functools.partial(autoencoder_forward, compress=compress))
    enc, dec = fwd(x, prepared)
    jax.block_until_ready((enc, dec))

    enc_ref, dec_ref = autoencoder_reference(x, params)
    assert enc.shape == (batch, compress_total)
    assert dec.shape == (batch, input_size)
    assert enc.dtype == jnp.float32
    assert dec.dtype == jnp.bfloat16
    assert jnp.allclose(enc, enc_ref, atol=2e-3, rtol=2e-3), \
        float(jnp.max(jnp.abs(enc - enc_ref)))
    dec_f32 = dec.astype(jnp.float32)
    assert jnp.allclose(dec_f32, dec_ref, atol=3e-2, rtol=3e-2), \
        float(jnp.max(jnp.abs(dec_f32 - dec_ref)))

    print("KERNEL_OK")
</pallas_src>

<mosaic_0001>
module attributes {stable_mosaic.version = 11 : i64} {
  func.func @autoencoder_kernel(%arg0: i32, %arg1: memref<256x256xf32, #tpu.memory_space<vmem>>, %arg2: memref<256x128xbf16, #tpu.memory_space<vmem>>, %arg3: memref<1x128xf32, #tpu.memory_space<vmem>>, %arg4: memref<128x64xbf16, #tpu.memory_space<vmem>>, %arg5: memref<1x64xf32, #tpu.memory_space<vmem>>, %arg6: memref<64x128xbf16, #tpu.memory_space<vmem>>, %arg7: memref<1x128xf32, #tpu.memory_space<vmem>>, %arg8: memref<128x64xbf16, #tpu.memory_space<vmem>>, %arg9: memref<1x64xf32, #tpu.memory_space<vmem>>, %arg10: memref<64x128xbf16, #tpu.memory_space<vmem>>, %arg11: memref<1x128xf32, #tpu.memory_space<vmem>>, %arg12: memref<128x256xbf16, #tpu.memory_space<vmem>>, %arg13: memref<1x256xf32, #tpu.memory_space<vmem>>, %arg14: memref<256x32xf32, #tpu.memory_space<vmem>>, %arg15: memref<256x256xbf16, #tpu.memory_space<vmem>>) attributes {dimension_semantics = [#tpu.dimension_semantics<parallel>], iteration_bounds = array<i64: 4>, scalar_prefetch = 0 : i64, scratch_operands = 0 : i64, tpu.core_type = #tpu.core_type<tc>, window_params = [{transform_indices = @transform_0, window_bounds = array<i64: 256, 256>}, {pipeline_mode = #tpu.pipeline_mode<synchronous>, transform_indices = @transform_1, window_bounds = array<i64: 256, 128>}, {pipeline_mode = #tpu.pipeline_mode<synchronous>, transform_indices = @transform_2, window_bounds = array<i64: 1, 128>}, {pipeline_mode = #tpu.pipeline_mode<synchronous>, transform_indices = @transform_3, window_bounds = array<i64: 128, 64>}, {pipeline_mode = #tpu.pipeline_mode<synchronous>, transform_indices = @transform_4, window_bounds = array<i64: 1, 64>}, {pipeline_mode = #tpu.pipeline_mode<synchronous>, transform_indices = @transform_5, window_bounds = array<i64: 64, 128>}, {pipeline_mode = #tpu.pipeline_mode<synchronous>, transform_indices = @transform_6, window_bounds = array<i64: 1, 128>}, {pipeline_mode = #tpu.pipeline_mode<synchronous>, transform_indices = @transform_7, window_bounds = array<i64: 128, 64>}, {pipeline_mode = #tpu.pipeline_mode<synchronous>, transform_indices = @transform_8, window_bounds = array<i64: 1, 64>}, {pipeline_mode = #tpu.pipeline_mode<synchronous>, transform_indices = @transform_9, window_bounds = array<i64: 64, 128>}, {pipeline_mode = #tpu.pipeline_mode<synchronous>, transform_indices = @transform_10, window_bounds = array<i64: 1, 128>}, {pipeline_mode = #tpu.pipeline_mode<synchronous>, transform_indices = @transform_11, window_bounds = array<i64: 128, 256>}, {pipeline_mode = #tpu.pipeline_mode<synchronous>, transform_indices = @transform_12, window_bounds = array<i64: 1, 256>}, {transform_indices = @transform_13, window_bounds = array<i64: 256, 32>}, {transform_indices = @transform_14, window_bounds = array<i64: 256, 256>}]} {
    %c0 = arith.constant 0 : index
    %c0_0 = arith.constant 0 : index
    %0 = vector.load %arg1[%c0, %c0_0] : memref<256x256xf32, #tpu.memory_space<vmem>>, vector<256x256xf32>
    %1 = arith.truncf %0 : vector<256x256xf32> to vector<256x256xbf16>
    %c0_1 = arith.constant 0 : index
    %c0_2 = arith.constant 0 : index
    %2 = vector.load %arg2[%c0_1, %c0_2] : memref<256x128xbf16, #tpu.memory_space<vmem>>, vector<256x128xbf16>
    %cst = arith.constant dense<0.000000e+00> : vector<256x128xf32>
    %3 = tpu.matmul %1, %2, %cst {dimension_numbers = #tpu.dot_dimension_numbers<[1], [0], [0], [1], [0, 0, 1, 1], [], []>} : vector<256x256xbf16>, vector<256x128xbf16>, vector<256x128xf32> -> vector<256x128xf32>
    %c0_3 = arith.constant 0 : index
    %c0_4 = arith.constant 0 : index
    %4 = vector.load %arg3[%c0_3, %c0_4] : memref<1x128xf32, #tpu.memory_space<vmem>>, vector<1x128xf32>
    %5 = vector.broadcast %4 : vector<1x128xf32> to vector<256x128xf32>
    %6 = arith.addf %3, %5 : vector<256x128xf32>
    %cst_5 = arith.constant 0.000000e+00 : f32
    %7 = vector.broadcast %cst_5 : f32 to vector<256x128xf32>
    %8 = arith.maximumf %6, %7 : vector<256x128xf32>
    %9 = arith.truncf %8 : vector<256x128xf32> to vector<256x128xbf16>
    %c0_6 = arith.constant 0 : index
    %c0_7 = arith.constant 0 : index
    %10 = vector.load %arg4[%c0_6, %c0_7] : memref<128x64xbf16, #tpu.memory_space<vmem>>, vector<128x64xbf16>
    %cst_8 = arith.constant dense<0.000000e+00> : vector<256x64xf32>
    %11 = tpu.matmul %9, %10, %cst_8 {dimension_numbers = #tpu.dot_dimension_numbers<[1], [0], [0], [1], [0, 0, 1, 1], [], []>} : vector<256x128xbf16>, vector<128x64xbf16>, vector<256x64xf32> -> vector<256x64xf32>
    %c0_9 = arith.constant 0 : index
    %c0_10 = arith.constant 0 : index
    %12 = vector.load %arg5[%c0_9, %c0_10] : memref<1x64xf32, #tpu.memory_space<vmem>>, vector<1x64xf32>
    %13 = vector.broadcast %12 : vector<1x64xf32> to vector<256x64xf32>
    %14 = arith.addf %11, %13 : vector<256x64xf32>
    %cst_11 = arith.constant 0.000000e+00 : f32
    %15 = vector.broadcast %cst_11 : f32 to vector<256x64xf32>
    %16 = arith.maximumf %14, %15 : vector<256x64xf32>
    %17 = arith.truncf %16 : vector<256x64xf32> to vector<256x64xbf16>
    %c0_12 = arith.constant 0 : index
    %c0_13 = arith.constant 0 : index
    %18 = vector.load %arg6[%c0_12, %c0_13] : memref<64x128xbf16, #tpu.memory_space<vmem>>, vector<64x128xbf16>
    %cst_14 = arith.constant dense<0.000000e+00> : vector<256x128xf32>
    %19 = tpu.matmul %17, %18, %cst_14 {dimension_numbers = #tpu.dot_dimension_numbers<[1], [0], [0], [1], [0, 0, 1, 1], [], []>} : vector<256x64xbf16>, vector<64x128xbf16>, vector<256x128xf32> -> vector<256x128xf32>
    %c0_15 = arith.constant 0 : index
    %c0_16 = arith.constant 0 : index
    %20 = vector.load %arg7[%c0_15, %c0_16] : memref<1x128xf32, #tpu.memory_space<vmem>>, vector<1x128xf32>
    %21 = vector.broadcast %20 : vector<1x128xf32> to vector<256x128xf32>
    %22 = arith.addf %19, %21 : vector<256x128xf32>
    %23 = vector.extract_strided_slice %22 {offsets = [0, 0], sizes = [256, 32], strides = [1, 1]} : vector<256x128xf32> to vector<256x32xf32>
    %c0_17 = arith.constant 0 : index
    %c0_18 = arith.constant 0 : index
    %24 = vector.load %arg14[%c0_17, %c0_18] : memref<256x32xf32, #tpu.memory_space<vmem>>, vector<256x32xf32>
    tpu.vector_store %arg14[%c0_17, %c0_18], %23 {strides = array<i32>} : memref<256x32xf32, #tpu.memory_space<vmem>>, vector<256x32xf32>,
    %25 = arith.truncf %22 : vector<256x128xf32> to vector<256x128xbf16>
    %c0_19 = arith.constant 0 : index
    %c0_20 = arith.constant 0 : index
    %26 = vector.load %arg8[%c0_19, %c0_20] : memref<128x64xbf16, #tpu.memory_space<vmem>>, vector<128x64xbf16>
    %cst_21 = arith.constant dense<0.000000e+00> : vector<256x64xf32>
    %27 = tpu.matmul %25, %26, %cst_21 {dimension_numbers = #tpu.dot_dimension_numbers<[1], [0], [0], [1], [0, 0, 1, 1], [], []>} : vector<256x128xbf16>, vector<128x64xbf16>, vector<256x64xf32> -> vector<256x64xf32>
    %c0_22 = arith.constant 0 : index
    %c0_23 = arith.constant 0 : index
    %28 = vector.load %arg9[%c0_22, %c0_23] : memref<1x64xf32, #tpu.memory_space<vmem>>, vector<1x64xf32>
    %29 = vector.broadcast %28 : vector<1x64xf32> to vector<256x64xf32>
    %30 = arith.addf %27, %29 : vector<256x64xf32>
    %cst_24 = arith.constant 0.000000e+00 : f32
    %31 = vector.broadcast %cst_24 : f32 to vector<256x64xf32>
    %32 = arith.maximumf %30, %31 : vector<256x64xf32>
    %33 = arith.truncf %32 : vector<256x64xf32> to vector<256x64xbf16>
    %c0_25 = arith.constant 0 : index
    %c0_26 = arith.constant 0 : index
    %34 = vector.load %arg10[%c0_25, %c0_26] : memref<64x128xbf16, #tpu.memory_space<vmem>>, vector<64x128xbf16>
    %cst_27 = arith.constant dense<0.000000e+00> : vector<256x128xf32>
    %35 = tpu.matmul %33, %34, %cst_27 {dimension_numbers = #tpu.dot_dimension_numbers<[1], [0], [0], [1], [0, 0, 1, 1], [], []>} : vector<256x64xbf16>, vector<64x128xbf16>, vector<256x128xf32> -> vector<256x128xf32>
    %c0_28 = arith.constant 0 : index
    %c0_29 = arith.constant 0 : index
    %36 = vector.load %arg11[%c0_28, %c0_29] : memref<1x128xf32, #tpu.memory_space<vmem>>, vector<1x128xf32>
    %37 = vector.broadcast %36 : vector<1x128xf32> to vector<256x128xf32>
    %38 = arith.addf %35, %37 : vector<256x128xf32>
    %cst_30 = arith.constant 0.000000e+00 : f32
    %39 = vector.broadcast %cst_30 : f32 to vector<256x128xf32>
    %40 = arith.maximumf %38, %39 : vector<256x128xf32>
    %41 = arith.truncf %40 : vector<256x128xf32> to vector<256x128xbf16>
    %c0_31 = arith.constant 0 : index
    %c0_32 = arith.constant 0 : index
    %42 = vector.load %arg12[%c0_31, %c0_32] : memref<128x256xbf16, #tpu.memory_space<vmem>>, vector<128x256xbf16>
    %cst_33 = arith.constant dense<0.000000e+00> : vector<256x256xf32>
    %43 = tpu.matmul %41, %42, %cst_33 {dimension_numbers = #tpu.dot_dimension_numbers<[1], [0], [0], [1], [0, 0, 1, 1], [], []>} : vector<256x128xbf16>, vector<128x256xbf16>, vector<256x256xf32> -> vector<256x256xf32>
    %c0_34 = arith.constant 0 : index
    %c0_35 = arith.constant 0 : index
    %44 = vector.load %arg13[%c0_34, %c0_35] : memref<1x256xf32, #tpu.memory_space<vmem>>, vector<1x256xf32>
    %45 = vector.broadcast %44 : vector<1x256xf32> to vector<256x256xf32>
    %46 = arith.addf %43, %45 : vector<256x256xf32>
    %47 = arith.truncf %46 : vector<256x256xf32> to vector<256x256xbf16>
    %48 = math.tanh %47 : vector<256x256xbf16>
    %c0_36 = arith.constant 0 : index
    %c0_37 = arith.constant 0 : index
    %49 = vector.load %arg15[%c0_36, %c0_37] : memref<256x256xbf16, #tpu.memory_space<vmem>>, vector<256x256xbf16>
    tpu.vector_store %arg15[%c0_36, %c0_37], %48 {strides = array<i32>} : memref<256x256xbf16, #tpu.memory_space<vmem>>, vector<256x256xbf16>,
    return
  }
  func.func @transform_0(%arg0: i32) -> (i32, i32) {
    %c0_i32 = arith.constant 0 : i32
    %c0_i32_0 = arith.constant 0 : i32
    return %arg0, %c0_i32 : i32, i32
  }
  func.func @transform_1(%arg0: i32) -> (i32, i32) {
    %c0_i32 = arith.constant 0 : i32
    %c0_i32_0 = arith.constant 0 : i32
    %c0_i32_1 = arith.constant 0 : i32
    return %c0_i32, %c0_i32_0 : i32, i32
  }
  func.func @transform_2(%arg0: i32) -> (i32, i32) {
    %c0_i32 = arith.constant 0 : i32
    %c0_i32_0 = arith.constant 0 : i32
    %c0_i32_1 = arith.constant 0 : i32
    return %c0_i32, %c0_i32_0 : i32, i32
  }
  func.func @transform_3(%arg0: i32) -> (i32, i32) {
    %c0_i32 = arith.constant 0 : i32
    %c0_i32_0 = arith.constant 0 : i32
    %c0_i32_1 = arith.constant 0 : i32
    return %c0_i32, %c0_i32_0 : i32, i32
  }
  func.func @transform_4(%arg0: i32) -> (i32, i32) {
    %c0_i32 = arith.constant 0 : i32
    %c0_i32_0 = arith.constant 0 : i32
    %c0_i32_1 = arith.constant 0 : i32
    return %c0_i32, %c0_i32_0 : i32, i32
  }
  func.func @transform_5(%arg0: i32) -> (i32, i32) {
    %c0_i32 = arith.constant 0 : i32
    %c0_i32_0 = arith.constant 0 : i32
    %c0_i32_1 = arith.constant 0 : i32
    return %c0_i32, %c0_i32_0 : i32, i32
  }
  func.func @transform_6(%arg0: i32) -> (i32, i32) {
    %c0_i32 = arith.constant 0 : i32
    %c0_i32_0 = arith.constant 0 : i32
    %c0_i32_1 = arith.constant 0 : i32
    return %c0_i32, %c0_i32_0 : i32, i32
  }
  func.func @transform_7(%arg0: i32) -> (i32, i32) {
    %c0_i32 = arith.constant 0 : i32
    %c0_i32_0 = arith.constant 0 : i32
    %c0_i32_1 = arith.constant 0 : i32
    return %c0_i32, %c0_i32_0 : i32, i32
  }
  func.func @transform_8(%arg0: i32) -> (i32, i32) {
    %c0_i32 = arith.constant 0 : i32
    %c0_i32_0 = arith.constant 0 : i32
    %c0_i32_1 = arith.constant 0 : i32
    return %c0_i32, %c0_i32_0 : i32, i32
  }
  func.func @transform_9(%arg0: i32) -> (i32, i32) {
    %c0_i32 = arith.constant 0 : i32
    %c0_i32_0 = arith.constant 0 : i32
    %c0_i32_1 = arith.constant 0 : i32
    return %c0_i32, %c0_i32_0 : i32, i32
  }
  func.func @transform_10(%arg0: i32) -> (i32, i32) {
    %c0_i32 = arith.constant 0 : i32
    %c0_i32_0 = arith.constant 0 : i32
    %c0_i32_1 = arith.constant 0 : i32
    return %c0_i32, %c0_i32_0 : i32, i32
  }
  func.func @transform_11(%arg0: i32) -> (i32, i32) {
    %c0_i32 = arith.constant 0 : i32
    %c0_i32_0 = arith.constant 0 : i32
    %c0_i32_1 = arith.constant 0 : i32
    return %c0_i32, %c0_i32_0 : i32, i32
  }
  func.func @transform_12(%arg0: i32) -> (i32, i32) {
    %c0_i32 = arith.constant 0 : i32
    %c0_i32_0 = arith.constant 0 : i32
    %c0_i32_1 = arith.constant 0 : i32
    return %c0_i32, %c0_i32_0 : i32, i32
  }
  func.func @transform_13(%arg0: i32) -> (i32, i32) {
    %c0_i32 = arith.constant 0 : i32
    %c0_i32_0 = arith.constant 0 : i32
    return %arg0, %c0_i32 : i32, i32
  }
  func.func @transform_14(%arg0: i32) -> (i32, i32) {
    %c0_i32 = arith.constant 0 : i32
    %c0_i32_0 = arith.constant 0 : i32
    return %arg0, %c0_i32 : i32, i32
  }
}

</mosaic_0001>

<bundles_post_ra>
// kernel: autoencoder_forward.1
= control target key start
LH: loop header
LB: loop body
LE: loop exit
PB: predicated region body
PF: predicated region fallthrough
CT: control target
= control target key end

     0   :  { %s4649_s0 = inlined_call_operand.hbm [shape: f32[1024,256], index: 0, kind: input, shape index: {}]   ;;  %s4650_s1 = inlined_call_operand.vmem [shape: bf16[256,128], index: 1, kind: input, shape index: {}]   ;;  %s4651_s2 = inlined_call_operand.vmem [shape: f32[1,128], index: 2, kind: input, shape index: {}]   ;;  %s4652_s3 = inlined_call_operand.vmem [shape: bf16[128,64], index: 3, kind: input, shape index: {}]   ;;  %s4653_s4 = inlined_call_operand.vmem [shape: f32[1,64], index: 4, kind: input, shape index: {}]   ;;  %s4654_s5 = inlined_call_operand.vmem [shape: bf16[64,128], index: 5, kind: input, shape index: {}]   ;;  %s4655_s6 = inlined_call_operand.vmem [shape: f32[1,128], index: 6, kind: input, shape index: {}]   ;;  %s4656_s7 = inlined_call_operand.vmem [shape: bf16[128,64], index: 7, kind: input, shape index: {}]   ;;  %s4657_s8 = inlined_call_operand.vmem [shape: f32[1,64], index: 8, kind: input, shape index: {}]   ;;  %s4658_s9 = inlined_call_operand.hbm [shape: bf16[64,128], index: 9, kind: input, shape index: {}]   ;;  %s4659_s10 = inlined_call_operand.vmem [shape: f32[1,128], index: 10, kind: input, shape index: {}]   ;;  %s4660_s11 = inlined_call_operand.hbm [shape: bf16[128,256], index: 11, kind: input, shape index: {}]   ;;  %s4661_s12 = inlined_call_operand.vmem [shape: f32[1,256], index: 12, kind: input, shape index: {}]   ;;  %s4662_s13 = inlined_call_operand.vmem [shape: f32[1024,32], index: 13, kind: output, shape index: {0}]   ;;  %s4663_s14 = inlined_call_operand.hbm [shape: bf16[1024,256], index: 14, kind: output, shape index: {1}]  }
   0x1   :  { %4674 = sst [smem:[#allocation18_spill]] %s4658_s9 }
   0x2   :  { %4675 = sst [smem:[#allocation19_spill]] %s4660_s11 }
   0x3   :  { %20 = vsyncpa [#allocation3], 0 }
   0x4   :  { %22 = vsyncpa [#allocation3 + $0x1], 0 }
   0x5   :  { %23 = vsyncpa [#allocation6], 0 }
   0x6   :  { %24 = vsyncpa [#allocation4], 0 }
   0x7   :  { %26 = vsyncpa [#allocation4 + $0x1], 0  ;;  %s3810_s29 = smov 0   ;;  %s3812_s30 = smov 0  }
   0x8   :  { %s3814_s15 = smov 0   ;;  %s3816_s16 = smov 0  }
   0x9 LB: > { %4676 = sst [smem:[#allocation12_spill]] %s3708_s29  ;;  %s3831_s17 = sadd.s32 4294967295, %s3720_s16   ;;  %s3720_s16 = sphi %s3816_s16, %s4700_s16   ;;  %s3716_s15 = sphi %s3814_s15, %s4702_s15   ;;  %s3712_s30 = sphi %s3812_s30, %s4704_s30   ;;  %s3708_s29 = sphi %s3810_s29, %s4703_s29  }
   0xa   : > { %4677 = sst [smem:[#allocation13_spill]] %s3716_s15  ;;  %s2825_s18 = sadd.s32 4294967294, %s3720_s16  }
   0xb   : > { %4678 = sst [smem:[#allocation14_spill]] %s3720_s16  ;;  %p52_p0 = scmp.ne.s32.totalorder %s3712_s30, %s3708_s29 }
   0xc   : > { %p4665_p1 = scmp.eq.s32.totalorder %s3831_s17, 0  ;;  %p360_p3 = scmp.eq.s32.totalorder %s2825_s18, 3 }
   0xd   : > { %p2826_p5 = scmp.ge.s32.totalorder %s3720_s16, 1  ;;  %p367_p7 = scmp.lt.s32.totalorder %s3720_s16, 5 }
   0xe   : > { %p3840_p4 = por %p4665_p1, %p52_p0  ;;  %p3845_p6 = por %p360_p3, %p52_p0 }
   0xf   : > { %p3850_p8 = pnand %p2826_p5, %p367_p7  ;;  %s3722_s22 = smov [#allocation5]  }
  0x10   : > { %s4679_s19 = scalar_select %p3840_p4, 1, 0 }
  0x11   : > { %s4680_s20 = scalar_select %p3845_p6, 1, 0 }
  0x12   : > { %s4682_s21 = scalar_select %p3850_p8, 1, 0 }
  0x13   : > { %4681 = sst [smem:[#allocation15_spill]] %s4680_s20  ;;  %s403_s23 = sshll.u32 %s3722_s22, 4  ;;  %s404_s23 = int_to_ptr.vmem [resolvable:$true] %s403_s23 }
  0x14   : > { %p3380_p9 = pneg %p3850_p8  ;;  %s3723_s25 = smov [#allocation7]  }
  0x15   : > { %s419_s26 = sshll.u32 %s3723_s25, 4  ;;  %s3583_s27 = scalar_lea.vmem %s404_s23, 512  ;;  %s420_s26 = int_to_ptr.vmem [resolvable:$true] %s419_s26 }
  0x16   : > { %p3858_p10 = pnand %p3380_p9, %p4665_p1  ;;  %p3584_p12 = scmp.ne.s32.totalorder %s404_s23, %s3583_s27 }
  0x17   : > { %p3591_p3 = scmp.lt.s32.totalorder %s404_s23, %s404_s23  ;;  %p3592_p5 = scmp.lt.s32.totalorder %s3583_s27, %s3583_s27 }
  0x18   : > { %p3574_p11 = pneg %p3858_p10 }
  0x19   : > { %p3593_p7 = por %p3592_p5, %p3591_p3 }
  0x1a   : > { %p3586_p13 = pnand %p3584_p12, %p3574_p11 }
  0x1c   : > { %p3587_p0 = pneg %p3586_p13 }
  0x1e   : > { %p3594_p9 = pnand %p3593_p7, %p3587_p0 }
  0x20   : > { %3597 = shalt.err (!%p3594_p9)
}
  0x21   : > { %s3724_s28 = smov 64   ;;  %s3725_s18 = smov 4  }
  0x22   : > { %s4684_s9 = sld [smem:[#allocation18_spill]]  ;;  %s3609_s20 = scalar_lea.vmem %s420_s26, 2048 }
  0x23   : > { %p3610_p1 = scmp.ne.s32.totalorder %s420_s26, %s3609_s20  ;;  %p3617_p2 = scmp.lt.s32.totalorder %s420_s26, %s420_s26 }
  0x24   : > { %p3618_p6 = scmp.lt.s32.totalorder %s3609_s20, %s3609_s20 }
  0x25   : > { %p3612_p12 = pnand %p3610_p1, %p3574_p11 }
  0x26   : > { %p3619_p3 = por %p3618_p6, %p3617_p2 }
  0x27   : > { %p3613_p13 = pneg %p3612_p12 }
  0x28   : > { %3383 = dma.hbm_to_vmem [thread:$0]  (!%p3858_p10), %s4684_s9, 512, %s404_s23, [#allocation6], %s3724_s28, %s3724_s28, %s3725_s18  }
  0x29   : > { %p3620_p0 = pnand %p3619_p3, %p3613_p13 }
  0x2b   : > { %3623 = shalt.err (!%p3620_p0)
}
  0x2c   : > { %s3726_s27 = smov 128   ;;  %s3727_s23 = smov 8  }
  0x2d   : > { %s4685_s11 = sld [smem:[#allocation19_spill]]  ;;  %s3881_s18 = sadd.s32 1, %s3720_s16  }
  0x2e   : > { %4686 = sst [smem:[#allocation16_spill]] %s3881_s18  ;;  %s36_s22 = ssub.s32 %s3720_s16, %s3881_s18 }
  0x2f   : > { %p37_p1 = scmp.eq.s32.totalorder %s36_s22, 0  ;;  %s39_s25 = sadd.s32 1, %s3716_s15 }
  0x30   : > { %p46_p2 = scmp.ne.s32.totalorder %s3716_s15, %s3712_s30  ;;  %p47_p6 = scmp.eq.s32.totalorder %s3720_s16, 0 }
  0x31   : > { %s3890_s9 = scalar_select %p37_p1, %s3716_s15, %s39_s25  }
  0x32   : > { %p48_p11 = por %p47_p6, %p46_p2  ;;  %p4688_p5 = scmp.eq.s32.totalorder %s3831_s17, 3 }
  0x33   : > { %3386 = dma.hbm_to_vmem [thread:$0]  (!%p3858_p10), %s4685_s11, 2048, %s420_s26, [#allocation6], %s3726_s27, %s3726_s27, %s3727_s23  }
  0x34   : > { %4687 = sst [smem:[#allocation17_spill]] %s3890_s9  ;;  %p3894_p7 = por %p4688_p5, %p46_p2 }
  0x35   : > { %p3397_p9 = scmp.lt.s32.totalorder %s3720_s16, 4  ;;  %s436_s24 = sand.u32 1, %s3716_s15  }
  0x36   : > { %s4689_s29 = scalar_select %p3894_p7, 1, 0 }
  0x37   : > { %s2830_s28 = sshll.u32 %s436_s24, 9  ;;  %s2973_s26 = sshll.u32 %s3720_s16, 13 }
  0x38   : > { %s3904_s20 = scalar_lea.hbm %s4649_s0, %s2973_s26  ;;  %s440_s22 = scalar_lea.vmem [#allocation2], %s2830_s28 }
  0x39   : > { %s448_s25 = sshll.u32 %s440_s22, 4  ;;  %p3908_p10 = pnand %p3397_p9, %p48_p11  ;;  %s3906_s25 = int_to_ptr.vmem [resolvable:$true] %s448_s25 }
  0x3a   : > { %s3912_s9 = scalar_lea.sflag [#allocation3], %s436_s24  ;;  %s3624_s15 = scalar_lea.hbm %s3904_s20, 8192 }
  0x3b   : > { %p3625_p12 = scmp.ne.s32.totalorder %s3904_s20, %s3624_s15  ;;  %p3626_p13 = pneg %p3908_p10 }
  0x3c   : > { %s3629_s28 = scalar_lea.hbm %s4649_s0, 32768  ;;  %p3630_p1 = scmp.lt.s32.totalorder %s3904_s20, %s4649_s0 }
  0x3d   : > { %p3627_p3 = pnand %p3626_p13, %p3625_p12  ;;  %p3631_p2 = scmp.lt.s32.totalorder %s3629_s28, %s3624_s15 }
  0x3f   : > { %p3628_p0 = pneg %p3627_p3  ;;  %p3632_p6 = por %p3631_p2, %p3630_p1 }
  0x41   : > { %p3633_p11 = pnand %p3632_p6, %p3628_p0 }
  0x43   : > { %3636 = shalt.err (!%p3633_p11)
}
  0x44   : > { %s3637_s24 = scalar_lea.vmem %s3906_s25, 8192  ;;  %s3728_s18 = smov [#allocation2]  }
  0x45   : > { %p3638_p5 = scmp.ne.s32.totalorder %s3906_s25, %s3637_s24  ;;  %s3642_s16 = sshll.u32 %s3728_s18, 4  ;;  %s3643_s16 = int_to_ptr.vmem [resolvable:$false] %s3642_s16 }
  0x46   : > { %s3644_s26 = scalar_lea.vmem %s3643_s16, 16384  ;;  %p3645_p3 = scmp.lt.s32.totalorder %s3906_s25, %s3643_s16 }
  0x47   : > { %p3640_p9 = pnand %p3638_p5, %p3626_p13  ;;  %p3646_p7 = scmp.lt.s32.totalorder %s3644_s26, %s3637_s24 }
  0x49   : > { %p3641_p12 = pneg %p3640_p9  ;;  %p3647_p4 = por %p3646_p7, %p3645_p3 }
  0x4b   : > { %p3648_p8 = pnand %p3647_p4, %p3641_p12 }
  0x4d   : > { %3651 = shalt.err (!%p3648_p8)
}
  0x4e   : > { %s3729_s15 = smov 256   ;;  %s3730_s27 = smov 16  }
  0x4f   : > { %3390 = dma.hbm_to_vmem [thread:$0]  (!%p3908_p10), %s3904_s20, 8192, %s3906_s25, %s3912_s9, %s3729_s15, %s3729_s15, %s3730_s27  }
  0x50   : > { %p4691_p13 = scmp.ne.s32.totalorder %s4682_s21, 0 }
  0x51   : > { %s3936_s18 = sand.u32 (!%p4691_p13), 1, %s3712_s30   ;;  %p4692_p4 = scmp.ne.s32.totalorder (!%p4691_p13), %s4679_s19, 0 }
  0x52   : > { %460 = sbr.rel (%p4691_p13) target bundleno = 1514 (0x5ea), region = 72  ;;  %s2835_s16 = sshll.u32 (!%p4691_p13), %s3936_s18, 9 }
  0x53   : > { %s463_s28 = scalar_lea.sflag (!%p4691_p13), [#allocation3], %s3936_s18  ;;  %s3940_s23 = scalar_lea.vmem (!%p4691_p13), [#allocation2], %s2835_s16 }
  0x57   : > { %3695 = dma.done.wait (%p4692_p4), %s463_s28, 8192  }
  0x58   : > { %3697 = vsyncadd (%p4692_p4), %s463_s28, 4294959104  ;;  %p4693_p8 = scmp.eq.s32.totalorder %s3831_s17, 0 }
  0x5a   : > { %3699 = dma.done.wait (%p4693_p8), [#allocation6], 2560   ;;  %p4694_p7 = pmov %p4693_p8 }
  0x5b   : > { %v3444_v0 = vld [vmem:[%s4650_s1 + $0x78] sm:$0xff]   ;;  %v3446_v2 = vld [vmem:[%s4650_s1 + $0x70] sm:$0xff]   ;;  %v3448_v4 = vld [vmem:[%s4650_s1 + $0x68] sm:$0xff]   ;;  %vm1292_vm0 = vcmask 523264   ;;  %s2839_s15 = sshll.u32 %s3831_s17, 5  ;;  %vm1502_vm1 = vcmask 261120  }
  0x5c   : > { %3701 = vsyncadd (%p4694_p7), [#allocation6], 4294964736  ;;  %v3445_v1 = vld [vmem:[%s4650_s1 + $0x38] sm:$0xff]   ;;  %2976 = vmatprep.subr.bf16.mxu0 %v3444_v0  ;;  %3352 = vmatprep.subr.bf16.mxu1 %v3444_v0  ;;  %v3447_v3 = vld [vmem:[%s4650_s1 + $0x30] sm:$0xff]   ;;  %p526_p10 = scmp.lt.s32.totalorder %s2839_s15, 127  ;;  %s2838_s26 = sshll.u32 %s3936_s18, 8 }
  0x5d   : > { %2977 = vmatpush3.bf16.msra.mxu0 %v3445_v1  ;;  %3360 = vmatpush3.bf16.msra.mxu1 %v3445_v1  ;;  %v3449_v5 = vld [vmem:[%s4650_s1 + $0x28] sm:$0xff]   ;;  %v3450_v6 = vld [vmem:[%s4650_s1 + $0x60] sm:$0xff]   ;;  %v3452_v8 = vld [vmem:[%s4650_s1 + $0x58] sm:$0xff]   ;;  %p4695_p1 = scmp.ne.s32.totalorder %s4689_s29, 0 }
  0x5e   : > { %2978 = vmatprep.subr.bf16.mxu0 %v3446_v2  ;;  %3353 = vmatprep.subr.bf16.mxu1 %v3446_v2  ;;  %v3451_v7 = vld [vmem:[%s4650_s1 + $0x20] sm:$0xff]   ;;  %v3453_v9 = vld [vmem:[%s4650_s1 + $0x18] sm:$0xff]   ;;  %v3454_v10 = vld [vmem:[%s4650_s1 + $0x50] sm:$0xff]   ;;  %s4706_s15 = smov (!%p526_p10, %s2839_s15), 127 }
  0x5f   : > { %v534_v11 = vld [vmem:[%s3940_s23 + $0x8] sm:$0xff]  ;;  %v536_v12 = vld [vmem:[%s3940_s23 + $0x18] sm:$0xff]  ;;  %v3455_v14 = vld [vmem:[%s4650_s1 + $0x10] sm:$0xff]   ;;  %s2840_s27 = sshll.u32 %s4706_s15, 3  ;;  %s4514_s15 = scalar_lea.vmem [#allocation8], %s2838_s26 }
  0x60   : > { %v598_v13 = vpack.c.bf16 %v536_v12, %v534_v11  ;;  %v3456_v15 = vld [vmem:[%s4650_s1 + $0x48] sm:$0xff]   ;;  %v568_v17 = vld [vmem:[%s3940_s23 + $0x118] sm:$0xff]  ;;  %v3458_v20 = vld [vmem:[%s4650_s1 + $0x40] sm:$0xff]   ;;  %s4290_s11 = scalar_lea.vmem %s4662_s13, %s2840_s27  ;;  %s2975_s27 = sshll.u32 %s3831_s17, 12 }
  0x61   : > { %2979 = vmatpush3.bf16.msra.mxu0 %v3447_v3  ;;  %3361 = vmatpush3.bf16.msra.mxu1 %v3447_v3  ;;  %v566_v16 = vld [vmem:[%s3940_s23 + $0x108] sm:$0xff]  ;;  %v3459_v21 = vld [vmem:[%s4650_s1] sm:$0xff]   ;;  %v535_v23 = vld [vmem:[%s3940_s23 + $0x10] sm:$0xff]  ;;  %s4603_s9 = scalar_lea.hbm %s4663_s14, %s2975_s27  ;;  %s3732_s17 = smov [#allocation8]  }
  0x62   : > { %2980 = vmatprep.subr.bf16.mxu0 %v3448_v4  ;;  %3354 = vmatprep.subr.bf16.mxu1 %v3448_v4  ;;  %v3457_v18 = vld [vmem:[%s4650_s1 + $0x8] sm:$0xff]   ;;  %v614_v19 = vpack.c.bf16 %v568_v17, %v566_v16  ;;  %v533_v22 = vld [vmem:[%s3940_s23] sm:$0xff]  ;;  %v540_v25 = vld [vmem:[%s3940_s23 + $0x38] sm:$0xff]  ;;  %s3656_s20 = sshll.u32 %s3732_s17, 4  ;;  %s3657_s20 = int_to_ptr.vmem [resolvable:$false] %s3656_s20 }
  0x63   : > { %796 = vmatprep.mubr.bf16.mxu0 %v598_v13  ;;  %v538_v24 = vld [vmem:[%s3940_s23 + $0x28] sm:$0xff]  ;;  %v565_v26 = vld [vmem:[%s3940_s23 + $0x100] sm:$0xff]  ;;  %v567_v27 = vld [vmem:[%s3940_s23 + $0x110] sm:$0xff]  ;;  %v597_v30 = vpack.c.bf16 %v535_v23, %v533_v22  ;;  %s3658_s25 = scalar_lea.vmem %s3657_s20, 8192 }
  0x64   : > { %860 = vmatprep.mubr.bf16.mxu1 %v614_v19  ;;  %v570_v28 = vld [vmem:[%s3940_s23 + $0x128] sm:$0xff]  ;;  %v572_v29 = vld [vmem:[%s3940_s23 + $0x138] sm:$0xff]  ;;  %v600_v31 = vpack.c.bf16 %v540_v25, %v538_v24  ;;  %v613_v32 = vpack.c.bf16 %v567_v27, %v565_v26  ;;  %v537_v34 = vld [vmem:[%s3940_s23 + $0x20] sm:$0xff] }
  0x65   : > { %2981 = vmatpush3.bf16.msra.mxu0 %v3449_v5  ;;  %3362 = vmatpush3.bf16.msra.mxu1 %v3449_v5  ;;  %v616_v33 = vpack.c.bf16 %v572_v29, %v570_v28  ;;  %v539_v35 = vld [vmem:[%s3940_s23 + $0x30] sm:$0xff]  ;;  %v542_v36 = vld [vmem:[%s3940_s23 + $0x48] sm:$0xff]  ;;  %v544_v37 = vld [vmem:[%s3940_s23 + $0x58] sm:$0xff] }
  0x66   : > { %2982 = vmatprep.subr.bf16.mxu0 %v3450_v6  ;;  %3355 = vmatprep.subr.bf16.mxu1 %v3450_v6  ;;  %v569_v38 = vld [vmem:[%s3940_s23 + $0x120] sm:$0xff]  ;;  %v571_v39 = vld [vmem:[%s3940_s23 + $0x130] sm:$0xff]  ;;  %v574_v40 = vld [vmem:[%s3940_s23 + $0x148] sm:$0xff]  ;;  %v599_v42 = vpack.c.bf16 %v539_v35, %v537_v34  ;;  %v602_v44 = vpack.c.bf16 %v544_v37, %v542_v36 }
  0x67   : > { %v576_v41 = vld [vmem:[%s3940_s23 + $0x158] sm:$0xff]  ;;  %v615_v45 = vpack.c.bf16 %v571_v39, %v569_v38  ;;  %v3461_v46 = vld [vmem:[%s4652_s3 + $0x30] sm:$0xff]   ;;  %v541_v48 = vld [vmem:[%s3940_s23 + $0x40] sm:$0xff] }
  0x68   : > { %v3460_v43 = vld [vmem:[%s4652_s3 + $0x38] sm:$0xff]   ;;  %v618_v47 = vpack.c.bf16 %v576_v41, %v574_v40  ;;  %v543_v49 = vld [vmem:[%s3940_s23 + $0x50] sm:$0xff]  ;;  %v546_v50 = vld [vmem:[%s3940_s23 + $0x68] sm:$0xff] }
  0x69   : > { %2983 = vmatpush3.bf16.msra.mxu0 %v3451_v7  ;;  %3363 = vmatpush3.bf16.msra.mxu1 %v3451_v7  ;;  %v548_v51 = vld [vmem:[%s3940_s23 + $0x78] sm:$0xff]  ;;  %v573_v52 = vld [vmem:[%s3940_s23 + $0x140] sm:$0xff]  ;;  %v575_v53 = vld [vmem:[%s3940_s23 + $0x150] sm:$0xff]  ;;  %v601_v58 = vpack.c.bf16 %v543_v49, %v541_v48 }
  0x6a   : > { %2984 = vmatprep.subr.bf16.mxu0 %v3452_v8  ;;  %3356 = vmatprep.subr.bf16.mxu1 %v3452_v8  ;;  %v3462_v54 = vld [vmem:[%s4652_s3 + $0x28] sm:$0xff]   ;;  %v580_v56 = vld [vmem:[%s3940_s23 + $0x178] sm:$0xff]  ;;  %v3463_v57 = vld [vmem:[%s4652_s3 + $0x20] sm:$0xff]   ;;  %v604_v59 = vpack.c.bf16 %v548_v51, %v546_v50  ;;  %v617_v60 = vpack.c.bf16 %v575_v53, %v573_v52 }
  0x6b   : > { %v578_v55 = vld [vmem:[%s3940_s23 + $0x168] sm:$0xff]  ;;  %v3464_v62 = vld [vmem:[%s4652_s3 + $0x18] sm:$0xff]   ;;  %v545_v63 = vld [vmem:[%s3940_s23 + $0x60] sm:$0xff] }
  0x6c   : > { %v620_v61 = vpack.c.bf16 %v580_v56, %v578_v55  ;;  %v547_v0 = vld [vmem:[%s3940_s23 + $0x70] sm:$0xff]  ;;  %v550_v1 = vld [vmem:[%s3940_s23 + $0x88] sm:$0xff]  ;;  %v552_v2 = vld [vmem:[%s3940_s23 + $0x98] sm:$0xff] }
  0x6d   : > { %2985 = vmatpush3.bf16.msra.mxu0 %v3453_v9  ;;  %3364 = vmatpush3.bf16.msra.mxu1 %v3453_v9  ;;  %v577_v3 = vld [vmem:[%s3940_s23 + $0x160] sm:$0xff]  ;;  %v579_v4 = vld [vmem:[%s3940_s23 + $0x170] sm:$0xff]  ;;  %v582_v5 = vld [vmem:[%s3940_s23 + $0x188] sm:$0xff]  ;;  %v603_v8 = vpack.c.bf16 %v547_v0, %v545_v63  ;;  %v606_v9 = vpack.c.bf16 %v552_v2, %v550_v1 }
  0x6e   : > { %2986 = vmatprep.subr.bf16.mxu0 %v3454_v10  ;;  %3357 = vmatprep.subr.bf16.mxu1 %v3454_v10  ;;  %v584_v6 = vld [vmem:[%s3940_s23 + $0x198] sm:$0xff]  ;;  %v3465_v7 = vld [vmem:[%s4652_s3 + $0x10] sm:$0xff]   ;;  %v619_v10 = vpack.c.bf16 %v579_v4, %v577_v3  ;;  %v549_v12 = vld [vmem:[%s3940_s23 + $0x80] sm:$0xff] }
  0x6f   : > { %v622_v11 = vpack.c.bf16 %v584_v6, %v582_v5  ;;  %v551_v13 = vld [vmem:[%s3940_s23 + $0x90] sm:$0xff]  ;;  %v581_v16 = vld [vmem:[%s3940_s23 + $0x180] sm:$0xff]  ;;  %v588_v19 = vld [vmem:[%s3940_s23 + $0x1b8] sm:$0xff] }
  0x70   : > { %v583_v17 = vld [vmem:[%s3940_s23 + $0x190] sm:$0xff]  ;;  %v553_v24 = vld [vmem:[%s3940_s23 + $0xa0] sm:$0xff]  ;;  %v558_v26 = vld [vmem:[%s3940_s23 + $0xc8] sm:$0xff] }
  0x71   : > { %2987 = vmatpush3.bf16.msra.mxu0 %v3455_v14  ;;  %3365 = vmatpush3.bf16.msra.mxu1 %v3455_v14  ;;  %v554_v14 = vld [vmem:[%s3940_s23 + $0xa8] sm:$0xff]  ;;  %v621_v22 = vpack.c.bf16 %v583_v17, %v581_v16  ;;  %v555_v25 = vld [vmem:[%s3940_s23 + $0xb0] sm:$0xff]  ;;  %v560_v27 = vld [vmem:[%s3940_s23 + $0xd8] sm:$0xff] }
  0x72   : > { %2988 = vmatprep.subr.bf16.mxu0 %v3456_v15  ;;  %3358 = vmatprep.subr.bf16.mxu1 %v3456_v15  ;;  %v556_v15 = vld [vmem:[%s3940_s23 + $0xb8] sm:$0xff]  ;;  %v585_v28 = vld [vmem:[%s3940_s23 + $0x1a0] sm:$0xff]  ;;  %v587_v29 = vld [vmem:[%s3940_s23 + $0x1b0] sm:$0xff] }
  0x73   : > { %v623_v34 = vpack.c.bf16 %v587_v29, %v585_v28  ;;  %v557_v36 = vld [vmem:[%s3940_s23 + $0xc0] sm:$0xff]  ;;  %v559_v37 = vld [vmem:[%s3940_s23 + $0xd0] sm:$0xff]  ;;  %v562_v38 = vld [vmem:[%s3940_s23 + $0xe8] sm:$0xff] }
  0x74   : > { %v564_v39 = vld [vmem:[%s3940_s23 + $0xf8] sm:$0xff]  ;;  %v589_v40 = vld [vmem:[%s3940_s23 + $0x1c0] sm:$0xff]  ;;  %v591_v41 = vld [vmem:[%s3940_s23 + $0x1d0] sm:$0xff] }
  0x75   : > { %2989 = vmatpush3.bf16.msra.mxu0 %v3457_v18  ;;  %3366 = vmatpush3.bf16.msra.mxu1 %v3457_v18  ;;  %v586_v18 = vld [vmem:[%s3940_s23 + $0x1a8] sm:$0xff]  ;;  %v561_v48 = vld [vmem:[%s3940_s23 + $0xe0] sm:$0xff]  ;;  %v563_v49 = vld [vmem:[%s3940_s23 + $0xf0] sm:$0xff] }
  0x76   : > { %2990 = vmatprep.subr.bf16.mxu0 %v3458_v20  ;;  %3359 = vmatprep.subr.bf16.mxu1 %v3458_v20  ;;  %v605_v20 = vpack.c.bf16 %v551_v13, %v549_v12  ;;  %v624_v23 = vpack.c.bf16 %v588_v19, %v586_v18  ;;  %v593_v50 = vld [vmem:[%s3940_s23 + $0x1e0] sm:$0xff]  ;;  %v595_v51 = vld [vmem:[%s3940_s23 + $0x1f0] sm:$0xff]  ;;  %v611_v52 = vpack.c.bf16 %v563_v49, %v561_v48  ;;  %v3468_v56 = vld [vmem:[%s4654_s5 + $0x18] sm:$0xff]  }
  0x77   : > { %v627_v53 = vpack.c.bf16 %v595_v51, %v593_v50  ;;  %v3467_v55 = vld [vmem:[%s4652_s3] sm:$0xff]  }
  0x78   : > { %v3471_v48 = vld [vmem:[%s4654_s5] sm:$0xff]  }
  0x79   : > { %2991 = vmatpush3.bf16.msra.mxu0 %v3459_v21  ;;  %3367 = vmatpush3.bf16.msra.mxu1 %v3459_v21  ;;  %v608_v21 = vpack.c.bf16 %v556_v15, %v554_v14 }
  0x7a   : > { %3176 = vmatprep.subr.bf16.mxu1 %v3460_v43 }
  0x7c   : > { %797 = vmatmul.mubr.bf16.vlgmr.msra.gmra.mxu0 %v597_v30  ;;  %861 = vmatmul.mubr.bf16.vlgmr.msra.gmra.mxu1 %v613_v32  ;;  %v590_v30 = vld [vmem:[%s3940_s23 + $0x1c8] sm:$0xff]  ;;  %v607_v32 = vpack.c.bf16 %v555_v25, %v553_v24 }
  0x7d   : > { %804 = vmatprep.mubr.bf16.mxu0 %v600_v31  ;;  %868 = vmatprep.mubr.bf16.mxu1 %v616_v33  ;;  %v592_v31 = vld [vmem:[%s3940_s23 + $0x1d8] sm:$0xff]  ;;  %v610_v33 = vpack.c.bf16 %v560_v27, %v558_v26 }
  0x7e   : > { %3177 = vmatpush3.bf16.msra.mxu1 %v3460_v43  ;;  %v626_v35 = vpack.c.bf16 %v592_v31, %v590_v30  ;;  %v596_v43 = vld [vmem:[%s3940_s23 + $0x1f8] sm:$0xff]  ;;  %v3469_v31 = vld [vmem:[%s4654_s5 + $0x10] sm:$0xff]  }
  0x7f   : > { %3178 = vmatprep.subr.bf16.mxu1 %v3461_v46 }
  0x82   : > { %3179 = vmatpush3.bf16.msra.mxu1 %v3461_v46  ;;  %v625_v46 = vpack.c.bf16 %v591_v41, %v589_v40 }
  0x83   : > { %3180 = vmatprep.subr.bf16.mxu1 %v3462_v54 }
  0x84   : > { %805 = vmatmul.mubr.bf16.gmra.mxu0 %v599_v42  ;;  %869 = vmatmul.mubr.bf16.gmra.mxu1 %v615_v45  ;;  %v594_v42 = vld [vmem:[%s3940_s23 + $0x1e8] sm:$0xff]  ;;  %v612_v45 = vpack.c.bf16 %v564_v39, %v562_v38  ;;  %s2708_s23 = sshll.u32 %s4514_s15, 4  ;;  %s4605_s23 = int_to_ptr.vmem [resolvable:$true] %s2708_s23 }
  0x85   : > { %812 = vmatprep.mubr.bf16.mxu0 %v602_v44  ;;  %876 = vmatprep.mubr.bf16.mxu1 %v618_v47  ;;  %v609_v44 = vpack.c.bf16 %v559_v37, %v557_v36  ;;  %v628_v47 = vpack.c.bf16 %v596_v43, %v594_v42  ;;  %v3470_v39 = vld [vmem:[%s4654_s5 + $0x8] sm:$0xff]   ;;  %s3652_s21 = scalar_lea.vmem %s4605_s23, 4096  ;;  %p3659_p11 = scmp.lt.s32.totalorder %s4605_s23, %s3657_s20 }
  0x86   : > { %3181 = vmatpush3.bf16.msra.mxu1 %v3462_v54  ;;  %v3466_v54 = vld [vmem:[%s4652_s3 + $0x8] sm:$0xff]   ;;  %p3653_p0 = scmp.ne.s32.totalorder %s4605_s23, %s3652_s21  ;;  %p3660_p5 = scmp.lt.s32.totalorder %s3658_s25, %s3652_s21 }
  0x87   : > { %3182 = vmatprep.subr.bf16.mxu1 %v3463_v57 }
  0x88   : > { %p3654_p2 = pnand %p3653_p0, %p4695_p1  ;;  %p3661_p9 = por %p3660_p5, %p3659_p11 }
  0x8a   : > { %3183 = vmatpush3.bf16.msra.mxu1 %v3463_v57  ;;  %p3655_p6 = pneg %p3654_p2 }
  0x8b   : > { %3184 = vmatprep.subr.bf16.mxu1 %v3464_v62 }
  0x8c   : > { %813 = vmatmul.mubr.bf16.gmra.mxu0 %v601_v58  ;;  %877 = vmatmul.mubr.bf16.gmra.mxu1 %v617_v60  ;;  %p3662_p12 = pnand %p3661_p9, %p3655_p6 }
  0x8d   : > { %820 = vmatprep.mubr.bf16.mxu0 %v604_v59  ;;  %884 = vmatprep.mubr.bf16.mxu1 %v620_v61 }
  0x8e   : > { %3185 = vmatpush3.bf16.msra.mxu1 %v3464_v62  ;;  %v4096_v62 = vld [vmem:[%s4651_s2] ss:$0 sm:$0xff] }
  0x8f   : > { %3186 = vmatprep.subr.bf16.mxu1 %v3465_v7 }
  0x92   : > { %3187 = vmatpush3.bf16.msra.mxu1 %v3465_v7 }
  0x93   : > { %3188 = vmatprep.subr.bf16.mxu1 %v3466_v54 }
  0x94   : > { %821 = vmatmul.mubr.bf16.gmra.mxu0 %v603_v8  ;;  %885 = vmatmul.mubr.bf16.gmra.mxu1 %v619_v10 }
  0x95   : > { %828 = vmatprep.mubr.bf16.mxu0 %v606_v9  ;;  %892 = vmatprep.mubr.bf16.mxu1 %v622_v11 }
  0x96   : > { %3189 = vmatpush3.bf16.msra.mxu1 %v3466_v54 }
  0x97   : > { %3190 = vmatprep.subr.bf16.mxu1 %v3467_v55 }
  0x9a   : > { %3191 = vmatpush3.bf16.msra.mxu1 %v3467_v55 }
  0x9b   : > { %3224 = vmatprep.subr.bf16.mxu1 %v3468_v56 }
  0x9c   : > { %829 = vmatmul.mubr.bf16.gmra.mxu0 %v605_v20  ;;  %893 = vmatmul.mubr.bf16.gmra.mxu1 %v621_v22 }
  0x9d   : > { %836 = vmatprep.mubr.bf16.mxu0 %v608_v21  ;;  %900 = vmatprep.mubr.bf16.mxu1 %v624_v23 }
  0xa4   : > { %837 = vmatmul.mubr.bf16.gmra.mxu0 %v607_v32  ;;  %901 = vmatmul.mubr.bf16.gmra.mxu1 %v623_v34 }
  0xa5   : > { %844 = vmatprep.mubr.bf16.mxu0 %v610_v33  ;;  %908 = vmatprep.mubr.bf16.mxu1 %v626_v35 }
  0xac   : > { %845 = vmatmul.mubr.bf16.gmra.mxu0 %v609_v44  ;;  %909 = vmatmul.mubr.bf16.gmra.mxu1 %v625_v46 }
  0xad   : > { %852 = vmatprep.mubr.bf16.mxu0 %v612_v45  ;;  %916 = vmatprep.mubr.bf16.mxu1 %v628_v47 }
  0xb4   : > { %853 = vmatmul.mubr.bf16.gmra.mxu0 %v611_v52  ;;  %917 = vmatmul.mubr.bf16.gmra.mxu1 %v627_v53 }
 0x13c   : > { %v2992_v57 = vpop.f32.mrf.mxu0  ;;  %v4089_v58 = vpop.f32.mrf.mxu1 }
 0x13e   : > { %v2993_v59 = vpop.f32.mrf.mxu0  ;;  %v4091_v61 = vpop.f32.mrf.mxu1 }
 0x13f   : > { %v2994_v60 = vadd.f32 %v2993_v59, %v2992_v57 }
 0x140   : > { %v2995_v63 = vpop.f32.mrf.mxu0  ;;  %v4098_v0 = vpop.f32.mrf.mxu1 }
 0x141   : > { %v799_v2 = vadd.f32 %v2994_v60, %v4096_v62 }
 0x142   : > { %v2996_v1 = vpop.f32.mrf.mxu0  ;;  %v4101_v4 = vpop.f32.mrf.mxu1 }
 0x143   : > { %v2997_v3 = vadd.f32 %v2996_v1, %v2995_v63  ;;  %v925_v9 = vmax.f32 %v799_v2, 0.0 }
 0x144   : > { %v2998_v5 = vpop.f32.mrf.mxu0  ;;  %v4104_v7 = vpop.f32.mrf.mxu1 }
 0x145   : > { %v802_v6 = vadd.f32 %v2997_v3, %v4096_v62 }
 0x146   : > { %v2999_v8 = vpop.f32.mrf.mxu0  ;;  %v4106_v12 = vpop.f32.mrf.mxu1 }
 0x147   : > { %v926_v10 = vmax.f32 %v802_v6, 0.0  ;;  %v3000_v11 = vadd.f32 %v2999_v8, %v2998_v5 }
 0x148   : > { %v3001_v13 = vpop.f32.mrf.mxu0  ;;  %v4108_v15 = vpop.f32.mrf.mxu1 }
 0x149   : > { %v957_v14 = vpack.c.bf16 %v926_v10, %v925_v9  ;;  %v807_v17 = vadd.f32 %v3000_v11, %v4096_v62 }
 0x14a   : > { %v3002_v16 = vpop.f32.mrf.mxu0  ;;  %v4111_v19 = vpop.f32.mrf.mxu1 }
 0x14b   : > { %v3003_v18 = vadd.f32 %v3002_v16, %v3001_v13  ;;  %3192 = vmatprep.mubr.bf16.mxu1 %v957_v14  ;;  %v927_v24 = vmax.f32 %v807_v17, 0.0 }
 0x14c   : > { %v3004_v20 = vpop.f32.mrf.mxu0  ;;  %v4114_v22 = vpop.f32.mrf.mxu1 }
 0x14d   : > { %v810_v21 = vadd.f32 %v3003_v18, %v4096_v62 }
 0x14e   : > { %v3005_v23 = vpop.f32.mrf.mxu0  ;;  %v4116_v27 = vpop.f32.mrf.mxu1 }
 0x14f   : > { %v928_v25 = vmax.f32 %v810_v21, 0.0  ;;  %v3006_v26 = vadd.f32 %v3005_v23, %v3004_v20 }
 0x150   : > { %v3007_v28 = vpop.f32.mrf.mxu0  ;;  %v4118_v30 = vpop.f32.mrf.mxu1 }
 0x151   : > { %v958_v29 = vpack.c.bf16 %v928_v25, %v927_v24  ;;  %v815_v33 = vadd.f32 %v3006_v26, %v4096_v62 }
 0x152   : > { %v3008_v32 = vpop.f32.mrf.mxu0  ;;  %v4124_v35 = vpop.f32.mrf.mxu1 }
 0x153   : > { %v3009_v34 = vadd.f32 %v3008_v32, %v3007_v28  ;;  %3193 = vmatmul.mubr.bf16.vlgmr.msra.gmra.mxu1 %v958_v29  ;;  %v929_v41 = vmax.f32 %v815_v33, 0.0 }
 0x154   : > { %v3010_v36 = vpop.f32.mrf.mxu0  ;;  %3225 = vmatpush3.bf16.msra.mxu1 %v3468_v56  ;;  %v4127_v38 = vpop.f32.mrf.mxu1 }
 0x155   : > { %v818_v37 = vadd.f32 %v3009_v34, %v4096_v62  ;;  %3226 = vmatprep.subr.bf16.mxu1 %v3469_v31 }
 0x156   : > { %v3011_v40 = vpop.f32.mrf.mxu0  ;;  %v4132_v44 = vpop.f32.mrf.mxu1 }
 0x157   : > { %v930_v42 = vmax.f32 %v818_v37, 0.0  ;;  %v3012_v43 = vadd.f32 %v3011_v40, %v3010_v36 }
 0x158   : > { %v3013_v45 = vpop.f32.mrf.mxu0  ;;  %3227 = vmatpush3.bf16.msra.mxu1 %v3469_v31  ;;  %v4134_v47 = vpop.f32.mrf.mxu1 }
 0x159   : > { %v959_v46 = vpack.c.bf16 %v930_v42, %v929_v41  ;;  %3228 = vmatprep.subr.bf16.mxu1 %v3470_v39  ;;  %v823_v50 = vadd.f32 %v3012_v43, %v4096_v62 }
 0x15a   : > { %v3014_v49 = vpop.f32.mrf.mxu0  ;;  %v4140_v52 = vpop.f32.mrf.mxu1 }
 0x15b   : > { %v3015_v51 = vadd.f32 %v3014_v49, %v3013_v45  ;;  %3196 = vmatprep.mubr.bf16.mxu1 %v959_v46  ;;  %v931_v57 = vmax.f32 %v823_v50, 0.0  ;;  %v3042_v45 = vadd.f32 %v4091_v61, %v4089_v58  ;;  %v3045_v46 = vadd.f32 %v4101_v4, %v4098_v0 }
 0x15c   : > { %v3016_v53 = vpop.f32.mrf.mxu0  ;;  %3229 = vmatpush3.bf16.msra.mxu1 %v3470_v39  ;;  %v4143_v55 = vpop.f32.mrf.mxu1  ;;  %v3048_v58 = vadd.f32 %v4106_v12, %v4104_v7  ;;  %v3051_v61 = vadd.f32 %v4111_v19, %v4108_v15 }
 0x15d   : > { %v826_v54 = vadd.f32 %v3015_v51, %v4096_v62  ;;  %3230 = vmatprep.subr.bf16.mxu1 %v3471_v48 }
 0x15e   : > { %v3017_v56 = vpop.f32.mrf.mxu0  ;;  %v4145_v63 = vpop.f32.mrf.mxu1  ;;  %v871_v7 = vadd.f32 %v3048_v58, %v4096_v62  ;;  %v874_v12 = vadd.f32 %v3051_v61, %v4096_v62  ;;  %v3472_v61 = vld [vmem:[%s4656_s7 + $0x38] sm:$0xff]  }
 0x15f   : > { %v932_v59 = vmax.f32 %v826_v54, 0.0  ;;  %v3018_v60 = vadd.f32 %v3017_v56, %v3016_v53  ;;  %3264 = vmatprep.subr.bf16.mxu0 %v3472_v61 }
 0x160   : > { %v3019_v1 = vpop.f32.mrf.mxu0  ;;  %3231 = vmatpush3.bf16.msra.mxu1 %v3471_v48  ;;  %v4147_v3 = vpop.f32.mrf.mxu1  ;;  %3265 = vmatpush3.bf16.msra.mxu0 %v3472_v61 }
 0x161   : > { %v960_v2 = vpack.c.bf16 %v932_v59, %v931_v57  ;;  %v831_v6 = vadd.f32 %v3018_v60, %v4096_v62  ;;  %v863_v57 = vadd.f32 %v3042_v45, %v4096_v62  ;;  %v866_v59 = vadd.f32 %v3045_v46, %v4096_v62 }
 0x162   : > { %v3020_v5 = vpop.f32.mrf.mxu0  ;;  %v4150_v9 = vpop.f32.mrf.mxu1 }
 0x163   : > { %v3021_v8 = vadd.f32 %v3020_v5, %v3019_v1  ;;  %3197 = vmatmul.mubr.bf16.gmra.mxu1 %v960_v2  ;;  %v933_v16 = vmax.f32 %v831_v6, 0.0  ;;  %v941_v6 = vmax.f32 %v863_v57, 0.0 }
 0x164   : > { %v3022_v10 = vpop.f32.mrf.mxu0  ;;  %v4153_v13 = vpop.f32.mrf.mxu1 }
 0x165   : > { %v834_v11 = vadd.f32 %v3021_v8, %v4096_v62  ;;  %v942_v8 = vmax.f32 %v866_v59, 0.0 }
 0x166   : > { %v3023_v14 = vpop.f32.mrf.mxu0  ;;  %v4155_v21 = vpop.f32.mrf.mxu1 }
 0x167   : > { %v934_v17 = vmax.f32 %v834_v11, 0.0  ;;  %v3024_v18 = vadd.f32 %v3023_v14, %v3022_v10  ;;  %v3054_v10 = vadd.f32 %v4116_v27, %v4114_v22  ;;  %v3057_v11 = vadd.f32 %v4124_v35, %v4118_v30 }
 0x168   : > { %v3025_v20 = vpop.f32.mrf.mxu0  ;;  %v4158_v29 = vpop.f32.mrf.mxu1  ;;  %v943_v22 = vmax.f32 %v871_v7, 0.0  ;;  %v944_v27 = vmax.f32 %v874_v12, 0.0  ;;  %v3060_v30 = vadd.f32 %v4132_v44, %v4127_v38  ;;  %v3063_v35 = vadd.f32 %v4140_v52, %v4134_v47 }
 0x169   : > { %v961_v23 = vpack.c.bf16 %v934_v17, %v933_v16  ;;  %v839_v25 = vadd.f32 %v3024_v18, %v4096_v62  ;;  %v879_v17 = vadd.f32 %v3054_v10, %v4096_v62  ;;  %v882_v18 = vadd.f32 %v3057_v11, %v4096_v62  ;;  %v3478_v10 = vld [vmem:[%s4656_s7 + $0x8] sm:$0xff]  }
 0x16a   : > { %v3026_v24 = vpop.f32.mrf.mxu0  ;;  %v3074_v39 = vpop.f32.mrf.mxu1 }
 0x16b   : > { %v3027_v26 = vadd.f32 %v3026_v24, %v3025_v20  ;;  %3200 = vmatprep.mubr.bf16.mxu1 %v961_v23  ;;  %v935_v33 = vmax.f32 %v839_v25, 0.0  ;;  %v965_v20 = vpack.c.bf16 %v942_v8, %v941_v6  ;;  %v945_v25 = vmax.f32 %v879_v17, 0.0  ;;  %v3476_v6 = vld [vmem:[%s4656_s7 + $0x18] sm:$0xff]   ;;  %v3477_v8 = vld [vmem:[%s4656_s7 + $0x10] sm:$0xff]  }
 0x16c   : > { %v3028_v28 = vpop.f32.mrf.mxu0  ;;  %v3076_v49 = vpop.f32.mrf.mxu1 }
 0x16d   : > { %v842_v31 = vadd.f32 %v3027_v26, %v4096_v62  ;;  %v946_v26 = vmax.f32 %v882_v18, 0.0 }
 0x16e   : > { %v3029_v32 = vpop.f32.mrf.mxu0  ;;  %v3077_v1 = vpop.f32.mrf.mxu1 }
 0x16f   : > { %v936_v34 = vmax.f32 %v842_v31, 0.0  ;;  %v3030_v36 = vadd.f32 %v3029_v32, %v3028_v28  ;;  %v3066_v28 = vadd.f32 %v4145_v63, %v4143_v55  ;;  %v3069_v31 = vadd.f32 %v4150_v9, %v4147_v3 }
 0x170   : > { %v3031_v37 = vpop.f32.mrf.mxu0  ;;  %v3079_v14 = vpop.f32.mrf.mxu1  ;;  %v967_v47 = vpack.c.bf16 %v946_v26, %v945_v25  ;;  %v3072_v55 = vadd.f32 %v4155_v21, %v4153_v13  ;;  %v3075_v63 = vadd.f32 %v3074_v39, %v4158_v29 }
 0x171   : > { %v962_v40 = vpack.c.bf16 %v936_v34, %v935_v33  ;;  %v847_v42 = vadd.f32 %v3030_v36, %v4096_v62  ;;  %v887_v33 = vadd.f32 %v3060_v30, %v4096_v62  ;;  %v890_v34 = vadd.f32 %v3063_v35, %v4096_v62 }
 0x172   : > { %v3032_v41 = vpop.f32.mrf.mxu0  ;;  %v3080_v23 = vpop.f32.mrf.mxu1  ;;  %v966_v36 = vpack.c.bf16 %v944_v27, %v943_v22  ;;  %v895_v38 = vadd.f32 %v3066_v28, %v4096_v62  ;;  %v898_v44 = vadd.f32 %v3069_v31, %v4096_v62  ;;  %v903_v45 = vadd.f32 %v3072_v55, %v4096_v62 }
 0x173   : > { %v3033_v43 = vadd.f32 %v3032_v41, %v3031_v37  ;;  %3201 = vmatmul.mubr.bf16.gmra.mxu1 %v962_v40  ;;  %v937_v53 = vmax.f32 %v847_v42, 0.0  ;;  %v947_v37 = vmax.f32 %v887_v33, 0.0  ;;  %v948_v40 = vmax.f32 %v890_v34, 0.0 }
 0x174   : > { %v3034_v48 = vpop.f32.mrf.mxu0  ;;  %v3082_v32 = vpop.f32.mrf.mxu1  ;;  %v949_v3 = vmax.f32 %v895_v38, 0.0  ;;  %v950_v9 = vmax.f32 %v898_v44, 0.0  ;;  %v3078_v41 = vadd.f32 %v3077_v1, %v3076_v49  ;;  %v3081_v42 = vadd.f32 %v3080_v23, %v3079_v14 }
 0x175   : > { %v850_v50 = vadd.f32 %v3033_v43, %v4096_v62  ;;  %v906_v46 = vadd.f32 %v3075_v63, %v4096_v62  ;;  %v951_v21 = vmax.f32 %v903_v45, 0.0 }
 0x176   : > { %v3035_v51 = vpop.f32.mrf.mxu0  ;;  %v3083_v52 = vpop.f32.mrf.mxu1  ;;  %v969_v13 = vpack.c.bf16 %v950_v9, %v949_v3 }
 0x177   : > { %v938_v54 = vmax.f32 %v850_v50, 0.0  ;;  %v3036_v56 = vadd.f32 %v3035_v51, %v3034_v48  ;;  %v968_v48 = vpack.c.bf16 %v948_v40, %v947_v37  ;;  %v911_v50 = vadd.f32 %v3078_v41, %v4096_v62 }
 0x178   : > { %v3037_v60 = vpop.f32.mrf.mxu0  ;;  %v3085_v43 = vpop.f32.mrf.mxu1  ;;  %v914_v51 = vadd.f32 %v3081_v42, %v4096_v62  ;;  %v952_v29 = vmax.f32 %v906_v46, 0.0  ;;  %v3084_v39 = vadd.f32 %v3083_v52, %v3082_v32 }
 0x179   : > { %v963_v2 = vpack.c.bf16 %v938_v54, %v937_v53  ;;  %v855_v0 = vadd.f32 %v3036_v56, %v4096_v62  ;;  %v953_v49 = vmax.f32 %v911_v50, 0.0 }
 0x17a   : > { %v3038_v5 = vpop.f32.mrf.mxu0  ;;  %v3086_v53 = vpop.f32.mrf.mxu1  ;;  %v954_v56 = vmax.f32 %v914_v51, 0.0  ;;  %v919_v57 = vadd.f32 %v3084_v39, %v4096_v62 }
 0x17b   : > { %v3039_v4 = vadd.f32 %v3038_v5, %v3037_v60  ;;  %3204 = vmatprep.mubr.bf16.mxu1 %v963_v2  ;;  %v939_v15 = vmax.f32 %v855_v0, 0.0  ;;  %v3087_v54 = vadd.f32 %v3086_v53, %v3085_v43  ;;  %v970_v60 = vpack.c.bf16 %v952_v29, %v951_v21  ;;  %v3473_v0 = vld [vmem:[%s4656_s7 + $0x30] sm:$0xff]  }
 0x17c   : > { %v971_v1 = vpack.c.bf16 %v954_v56, %v953_v49  ;;  %v955_v2 = vmax.f32 %v919_v57, 0.0  ;;  %3266 = vmatprep.subr.bf16.mxu0 %v3473_v0 }
 0x17d   : > { %v858_v16 = vadd.f32 %v3039_v4, %v4096_v62  ;;  %v922_v59 = vadd.f32 %v3087_v54, %v4096_v62  ;;  %v3474_v62 = vld [vmem:[%s4656_s7 + $0x28] sm:$0xff]   ;;  %3267 = vmatpush3.bf16.msra.mxu0 %v3473_v0  ;;  %v3475_v4 = vld [vmem:[%s4656_s7 + $0x20] sm:$0xff]  }
 0x17e   : > { %3268 = vmatprep.subr.bf16.mxu0 %v3474_v62 }
 0x17f   : > { %v940_v19 = vmax.f32 %v858_v16, 0.0  ;;  %v956_v5 = vmax.f32 %v922_v59, 0.0  ;;  %v4228_v16 = vld [vmem:[%s4653_s4] ss:$0 sm:$0xff] }
 0x181   : > { %v964_v24 = vpack.c.bf16 %v940_v19, %v939_v15  ;;  %v972_v58 = vpack.c.bf16 %v956_v5, %v955_v2  ;;  %3269 = vmatpush3.bf16.msra.mxu0 %v3474_v62 }
 0x182   : > { %3270 = vmatprep.subr.bf16.mxu0 %v3475_v4 }
 0x183   : > { %3205 = vmatmul.mubr.bf16.gmra.mxu1 %v964_v24 }
 0x184   : > { %3208 = vmatprep.mubr.bf16.mxu1 %v965_v20 }
 0x185   : > { %3271 = vmatpush3.bf16.msra.mxu0 %v3475_v4 }
 0x186   : > { %3272 = vmatprep.subr.bf16.mxu0 %v3476_v6 }
 0x189   : > { %3273 = vmatpush3.bf16.msra.mxu0 %v3476_v6 }
 0x18a   : > { %3274 = vmatprep.subr.bf16.mxu0 %v3477_v8 }
 0x18b   : > { %3209 = vmatmul.mubr.bf16.gmra.mxu1 %v966_v36 }
 0x18c   : > { %3212 = vmatprep.mubr.bf16.mxu1 %v967_v47 }
 0x18d   : > { %3275 = vmatpush3.bf16.msra.mxu0 %v3477_v8 }
 0x18e   : > { %3276 = vmatprep.subr.bf16.mxu0 %v3478_v10 }
 0x191   : > { %3277 = vmatpush3.bf16.msra.mxu0 %v3478_v10 }
 0x193   : > { %3213 = vmatmul.mubr.bf16.gmra.mxu1 %v968_v48 }
 0x194   : > { %3216 = vmatprep.mubr.bf16.mxu1 %v969_v13 }
 0x19b   : > { %3217 = vmatmul.mubr.bf16.gmra.mxu1 %v970_v60 }
 0x19c   : > { %3220 = vmatprep.mubr.bf16.mxu1 %v971_v1 }
 0x1a3   : > { %3221 = vmatmul.mubr.bf16.gmra.mxu1 %v972_v58 }
 0x213   : > { %v3194_v11 = vpop.f32.mrf.mxu1 }
 0x214   : > { %v1087_v19 = vadd.f32 %v3194_v11, %v4228_v16 }
 0x215   : > { %v1078_v14 = vpop.f32.mrf.mxu1 }
 0x216   : > { %v1079_v12 = vadd.f32 %v4228_v16, %v1078_v14  ;;  %v1207_v22 = vmax.f32 %v1087_v19, 0.0 }
 0x217   : > { %v3195_v7 = vpop.f32.mrf.mxu1 }
 0x218   : > { %v1090_v15 = vadd.f32 %v3195_v7, %v4228_v16  ;;  %v1205_v23 = vmax.f32 %v1079_v12, 0.0 }
 0x219   : > { %v1081_v17 = vpop.f32.mrf.mxu1 }
 0x21a   : > { %v1082_v18 = vadd.f32 %v4228_v16, %v1081_v17  ;;  %v1208_v20 = vmax.f32 %v1090_v15, 0.0 }
 0x21c   : > { %v1206_v24 = vmax.f32 %v1082_v18, 0.0  ;;  %v1238_v30 = vpack.c.bf16 %v1208_v20, %v1207_v22 }
 0x21e   : > { %v1237_v27 = vpack.c.bf16 %v1206_v24, %v1205_v23 }
 0x220   : > { %3232 = vmatprep.mubr.msk.bf16.mxu1 %vm1292_vm0, %v1237_v27 }
 0x221   : > { %3233 = vmatmul.mubr.msk.bf16.vlgmr.msra.gmra.mxu1 %vm1292_vm0, %v1238_v30 }
 0x223   : > { %v3198_v35 = vpop.f32.mrf.mxu1 }
 0x224   : > { %v1103_v32 = vadd.f32 %v3198_v35, %v4228_v16 }
 0x225   : > { %v1094_v25 = vpop.f32.mrf.mxu1 }
 0x226   : > { %v1095_v28 = vadd.f32 %v4228_v16, %v1094_v25  ;;  %v1211_v47 = vmax.f32 %v1103_v32, 0.0 }
 0x227   : > { %v3199_v26 = vpop.f32.mrf.mxu1 }
 0x228   : > { %v1106_v31 = vadd.f32 %v3199_v26, %v4228_v16  ;;  %v1209_v38 = vmax.f32 %v1095_v28, 0.0 }
 0x229   : > { %v1097_v33 = vpop.f32.mrf.mxu1 }
 0x22a   : > { %v1098_v34 = vadd.f32 %v4228_v16, %v1097_v33  ;;  %v1212_v36 = vmax.f32 %v1106_v31, 0.0 }
 0x22c   : > { %v1210_v44 = vmax.f32 %v1098_v34, 0.0  ;;  %v1240_v37 = vpack.c.bf16 %v1212_v36, %v1211_v47 }
 0x22e   : > { %v1239_v52 = vpack.c.bf16 %v1210_v44, %v1209_v38 }
 0x230   : > { %3236 = vmatprep.mubr.msk.bf16.mxu1 %vm1292_vm0, %v1239_v52 }
 0x231   : > { %3237 = vmatmul.mubr.msk.bf16.gmra.mxu1 %vm1292_vm0, %v1240_v37 }
 0x233   : > { %v3202_v40 = vpop.f32.mrf.mxu1 }
 0x234   : > { %v1119_v41 = vadd.f32 %v3202_v40, %v4228_v16 }
 0x235   : > { %v1110_v55 = vpop.f32.mrf.mxu1 }
 0x236   : > { %v1111_v3 = vadd.f32 %v4228_v16, %v1110_v55  ;;  %v1215_v50 = vmax.f32 %v1119_v41, 0.0 }
 0x237   : > { %v3203_v63 = vpop.f32.mrf.mxu1 }
 0x238   : > { %v1122_v9 = vadd.f32 %v3203_v63, %v4228_v16  ;;  %v1213_v46 = vmax.f32 %v1111_v3, 0.0 }
 0x239   : > { %v1113_v42 = vpop.f32.mrf.mxu1 }
 0x23a   : > { %v1114_v43 = vadd.f32 %v4228_v16, %v1113_v42  ;;  %v1216_v45 = vmax.f32 %v1122_v9, 0.0 }
 0x23c   : > { %v1214_v48 = vmax.f32 %v1114_v43, 0.0  ;;  %v1242_v53 = vpack.c.bf16 %v1216_v45, %v1215_v50  ;;  %v3479_v50 = vld [vmem:[%s4656_s7] sm:$0xff]  }
 0x23d   : > { %3278 = vmatprep.subr.bf16.mxu0 %v3479_v50 }
 0x23e   : > { %v1241_v51 = vpack.c.bf16 %v1214_v48, %v1213_v46  ;;  %3279 = vmatpush3.bf16.msra.mxu0 %v3479_v50 }
 0x240   : > { %3240 = vmatprep.mubr.msk.bf16.mxu1 %vm1292_vm0, %v1241_v51 }
 0x241   : > { %3241 = vmatmul.mubr.msk.bf16.gmra.mxu1 %vm1292_vm0, %v1242_v53 }
 0x243   : > { %v3206_v13 = vpop.f32.mrf.mxu1 }
 0x244   : > { %v1135_v49 = vadd.f32 %v3206_v13, %v4228_v16 }
 0x245   : > { %v1126_v21 = vpop.f32.mrf.mxu1 }
 0x246   : > { %v1127_v39 = vadd.f32 %v4228_v16, %v1126_v21  ;;  %v1219_v5 = vmax.f32 %v1135_v49, 0.0 }
 0x247   : > { %v3207_v29 = vpop.f32.mrf.mxu1 }
 0x248   : > { %v1138_v54 = vadd.f32 %v3207_v29, %v4228_v16  ;;  %v1217_v1 = vmax.f32 %v1127_v39, 0.0 }
 0x249   : > { %v1129_v56 = vpop.f32.mrf.mxu1 }
 0x24a   : > { %v1130_v57 = vadd.f32 %v4228_v16, %v1129_v56  ;;  %v1220_v59 = vmax.f32 %v1138_v54, 0.0 }
 0x24b   : > { %v3210_v60 = vpop.f32.mrf.mxu1 }
 0x24c   : > { %v1218_v2 = vmax.f32 %v1130_v57, 0.0  ;;  %v1244_v0 = vpack.c.bf16 %v1220_v59, %v1219_v5  ;;  %v1151_v8 = vadd.f32 %v3210_v60, %v4228_v16  ;;  %v3480_v59 = vld [vmem:[#allocation5 + $0x18] sm:$0xff]   ;;  %v3481_v60 = vld [vmem:[#allocation5 + $0x10] sm:$0xff]  }
 0x24d   : > { %v1142_v58 = vpop.f32.mrf.mxu1  ;;  %3312 = vmatprep.subr.bf16.mxu1 %v3480_v59 }
 0x24e   : > { %v1243_v61 = vpack.c.bf16 %v1218_v2, %v1217_v1  ;;  %v1143_v4 = vadd.f32 %v4228_v16, %v1142_v58  ;;  %v1223_v19 = vmax.f32 %v1151_v8, 0.0  ;;  %3313 = vmatpush3.bf16.msra.mxu1 %v3480_v59  ;;  %v3482_v1 = vld [vmem:[#allocation5 + $0x8] sm:$0xff]   ;;  %v3483_v2 = vld [vmem:[#allocation5] sm:$0xff]  }
 0x24f   : > { %v3211_v62 = vpop.f32.mrf.mxu1  ;;  %3314 = vmatprep.subr.bf16.mxu1 %v3481_v60 }
 0x250   : > { %v1154_v6 = vadd.f32 %v3211_v62, %v4228_v16  ;;  %3244 = vmatprep.mubr.msk.bf16.mxu1 %vm1292_vm0, %v1243_v61  ;;  %v1221_v12 = vmax.f32 %v1143_v4, 0.0 }
 0x251   : > { %v1145_v10 = vpop.f32.mrf.mxu1  ;;  %3245 = vmatmul.mubr.msk.bf16.gmra.mxu1 %vm1292_vm0, %v1244_v0 }
 0x252   : > { %v1146_v11 = vadd.f32 %v4228_v16, %v1145_v10  ;;  %v1224_v14 = vmax.f32 %v1154_v6, 0.0  ;;  %3315 = vmatpush3.bf16.msra.mxu1 %v3481_v60 }
 0x253   : > { %v3214_v7 = vpop.f32.mrf.mxu1  ;;  %3316 = vmatprep.subr.bf16.mxu1 %v3482_v1 }
 0x254   : > { %v1222_v15 = vmax.f32 %v1146_v11, 0.0  ;;  %v1167_v17 = vadd.f32 %v3214_v7, %v4228_v16  ;;  %v1246_v24 = vpack.c.bf16 %v1224_v14, %v1223_v19 }
 0x255   : > { %v1158_v18 = vpop.f32.mrf.mxu1 }
 0x256   : > { %v1245_v20 = vpack.c.bf16 %v1222_v15, %v1221_v12  ;;  %v1159_v23 = vadd.f32 %v4228_v16, %v1158_v18  ;;  %v1227_v30 = vmax.f32 %v1167_v17, 0.0  ;;  %3317 = vmatpush3.bf16.msra.mxu1 %v3482_v1 }
 0x257   : > { %v3215_v22 = vpop.f32.mrf.mxu1  ;;  %3318 = vmatprep.subr.bf16.mxu1 %v3483_v2 }
 0x258   : > { %v1170_v27 = vadd.f32 %v3215_v22, %v4228_v16  ;;  %3248 = vmatprep.mubr.msk.bf16.mxu1 %vm1292_vm0, %v1245_v20  ;;  %v1225_v25 = vmax.f32 %v1159_v23, 0.0 }
 0x259   : > { %v1161_v35 = vpop.f32.mrf.mxu1  ;;  %3249 = vmatmul.mubr.msk.bf16.gmra.mxu1 %vm1292_vm0, %v1246_v24 }
 0x25a   : > { %v1228_v26 = vmax.f32 %v1170_v27, 0.0  ;;  %v1162_v28 = vadd.f32 %v4228_v16, %v1161_v35  ;;  %3319 = vmatpush3.bf16.msra.mxu1 %v3483_v2 }
 0x25b   : > { %v3218_v31 = vpop.f32.mrf.mxu1 }
 0x25c   : > { %v1226_v32 = vmax.f32 %v1162_v28, 0.0  ;;  %v1248_v33 = vpack.c.bf16 %v1228_v26, %v1227_v30  ;;  %v1183_v34 = vadd.f32 %v3218_v31, %v4228_v16 }
 0x25d   : > { %v1174_v36 = vpop.f32.mrf.mxu1 }
 0x25e   : > { %v1247_v38 = vpack.c.bf16 %v1226_v32, %v1225_v25  ;;  %v1175_v44 = vadd.f32 %v4228_v16, %v1174_v36  ;;  %v1231_v37 = vmax.f32 %v1183_v34, 0.0 }
 0x25f   : > { %v3219_v47 = vpop.f32.mrf.mxu1 }
 0x260   : > { %v1186_v52 = vadd.f32 %v3219_v47, %v4228_v16  ;;  %3252 = vmatprep.mubr.msk.bf16.mxu1 %vm1292_vm0, %v1247_v38  ;;  %v1229_v55 = vmax.f32 %v1175_v44, 0.0 }
 0x261   : > { %v1177_v40 = vpop.f32.mrf.mxu1  ;;  %3253 = vmatmul.mubr.msk.bf16.gmra.mxu1 %vm1292_vm0, %v1248_v33 }
 0x262   : > { %v1232_v63 = vmax.f32 %v1186_v52, 0.0  ;;  %v1178_v3 = vadd.f32 %v4228_v16, %v1177_v40 }
 0x263   : > { %v3222_v9 = vpop.f32.mrf.mxu1 }
 0x264   : > { %v1230_v41 = vmax.f32 %v1178_v3, 0.0  ;;  %v1250_v42 = vpack.c.bf16 %v1232_v63, %v1231_v37  ;;  %v1199_v43 = vadd.f32 %v3222_v9, %v4228_v16 }
 0x265   : > { %v1190_v45 = vpop.f32.mrf.mxu1 }
 0x266   : > { %v1249_v46 = vpack.c.bf16 %v1230_v41, %v1229_v55  ;;  %v1191_v48 = vadd.f32 %v4228_v16, %v1190_v45  ;;  %v1235_v13 = vmax.f32 %v1199_v43, 0.0 }
 0x267   : > { %v3223_v51 = vpop.f32.mrf.mxu1 }
 0x268   : > { %v1202_v53 = vadd.f32 %v3223_v51, %v4228_v16  ;;  %3256 = vmatprep.mubr.msk.bf16.mxu1 %vm1292_vm0, %v1249_v46  ;;  %v1233_v29 = vmax.f32 %v1191_v48, 0.0 }
 0x269   : > { %v1193_v21 = vpop.f32.mrf.mxu1  ;;  %3257 = vmatmul.mubr.msk.bf16.gmra.mxu1 %vm1292_vm0, %v1250_v42 }
 0x26a   : > { %v1236_v39 = vmax.f32 %v1202_v53, 0.0  ;;  %v1194_v54 = vadd.f32 %v4228_v16, %v1193_v21  ;;  %v4285_v16 = vld [vmem:[%s4655_s6] ss:$0 sm:$0xff] }
 0x26c   : > { %v1234_v49 = vmax.f32 %v1194_v54, 0.0  ;;  %v1252_v56 = vpack.c.bf16 %v1236_v39, %v1235_v13 }
 0x26e   : > { %v1251_v57 = vpack.c.bf16 %v1234_v49, %v1233_v29 }
 0x270   : > { %3260 = vmatprep.mubr.msk.bf16.mxu1 %vm1292_vm0, %v1251_v57 }
 0x271   : > { %3261 = vmatmul.mubr.msk.bf16.gmra.mxu1 %vm1292_vm0, %v1252_v56 }
 0x2e1   : > { %v3234_v5 = vpop.f32.mrf.mxu1 }
 0x2e2   : > { %v1384_v58 = vadd.f32 %v3234_v5, %v4285_v16 }
 0x2e3   : > { %v1375_v61 = vpop.f32.mrf.mxu1 }
 0x2e4   : > { %1505 = vst.msk [vmem:[%s4290_s11 + $0x10] sm:$0xff] %vm1502_vm1, %v1384_v58  ;;  %v1376_v0 = vadd.f32 %v4285_v16, %v1375_v61 }
 0x2e5   : > { %v3235_v62 = vpop.f32.mrf.mxu1 }
 0x2e6   : > { %1503 = vst.msk [vmem:[%s4290_s11] sm:$0xff] %vm1502_vm1, %v1376_v0  ;;  %v1387_v4 = vadd.f32 %v3235_v62, %v4285_v16 }
 0x2e7   : > { %v1378_v6 = vpop.f32.mrf.mxu1 }
 0x2e8   : > { %1506 = vst.msk [vmem:[%s4290_s11 + $0x18] sm:$0xff] %vm1502_vm1, %v1387_v4  ;;  %v1379_v8 = vadd.f32 %v4285_v16, %v1378_v6  ;;  %v1536_v11 = vpack.c.bf16 %v1387_v4, %v1384_v58 }
 0x2ea   : > { %1504 = vst.msk [vmem:[%s4290_s11 + $0x8] sm:$0xff] %vm1502_vm1, %v1379_v8  ;;  %v1535_v10 = vpack.c.bf16 %v1379_v8, %v1376_v0 }
 0x2ec   : > { %3280 = vmatprep.mubr.bf16.mxu0 %v1535_v10 }
 0x2ed   : > { %3281 = vmatmul.mubr.bf16.vlgmr.msra.gmra.mxu0 %v1536_v11 }
 0x2f1   : > { %v3238_v14 = vpop.f32.mrf.mxu1 }
 0x2f2   : > { %v1400_v7 = vadd.f32 %v3238_v14, %v4285_v16 }
 0x2f3   : > { %v1391_v12 = vpop.f32.mrf.mxu1 }
 0x2f4   : > { %1509 = vst.msk [vmem:[%s4290_s11 + $0x30] sm:$0xff] %vm1502_vm1, %v1400_v7  ;;  %v1392_v15 = vadd.f32 %v4285_v16, %v1391_v12 }
 0x2f5   : > { %v3239_v19 = vpop.f32.mrf.mxu1 }
 0x2f6   : > { %1507 = vst.msk [vmem:[%s4290_s11 + $0x20] sm:$0xff] %vm1502_vm1, %v1392_v15  ;;  %v1403_v17 = vadd.f32 %v3239_v19, %v4285_v16 }
 0x2f7   : > { %v1394_v18 = vpop.f32.mrf.mxu1 }
 0x2f8   : > { %1510 = vst.msk [vmem:[%s4290_s11 + $0x38] sm:$0xff] %vm1502_vm1, %v1403_v17  ;;  %v1395_v20 = vadd.f32 %v4285_v16, %v1394_v18  ;;  %v1538_v24 = vpack.c.bf16 %v1403_v17, %v1400_v7 }
 0x2fa   : > { %1508 = vst.msk [vmem:[%s4290_s11 + $0x28] sm:$0xff] %vm1502_vm1, %v1395_v20  ;;  %v1537_v23 = vpack.c.bf16 %v1395_v20, %v1392_v15  ;;  %v3484_v20 = vld [vmem:[#allocation7 + $0x70] ss:$8 sps:$4 sm:$0xff]  }
 0x2fc   : > { %3284 = vmatprep.mubr.bf16.mxu0 %v1537_v23  ;;  %v3486_v23 = vld [vmem:[#allocation7 + $0x74] ss:$8 sps:$4 sm:$0xff]  }
 0x2fd   : > { %3285 = vmatmul.mubr.bf16.gmra.mxu0 %v1538_v24  ;;  %v3489_v24 = vld [vmem:[#allocation7 + $0x64] ss:$8 sps:$4 sm:$0xff]   ;;  %2235 = vmatprep.subr.bf16.mxu0 %v3486_v23 }
 0x2fe   : > { %2236 = vmatpush1.bf16.msra.mxu0 %v3484_v20 }
 0x2ff   : > { %2237 = vmatprep.subr.bf16.mxu0 %v3489_v24 }
 0x301   : > { %v3242_v22 = vpop.f32.mrf.mxu1 }
 0x302   : > { %v1416_v27 = vadd.f32 %v3242_v22, %v4285_v16  ;;  %v3487_v22 = vld [vmem:[#allocation7 + $0x60] ss:$8 sps:$4 sm:$0xff]  }
 0x303   : > { %v1407_v30 = vpop.f32.mrf.mxu1  ;;  %2238 = vmatpush1.bf16.msra.mxu0 %v3487_v22 }
 0x304   : > { %1513 = vst.msk [vmem:[%s4290_s11 + $0x50] sm:$0xff] %vm1502_vm1, %v1416_v27  ;;  %v1408_v35 = vadd.f32 %v4285_v16, %v1407_v30  ;;  %v3490_v30 = vld [vmem:[#allocation7 + $0x50] ss:$8 sps:$4 sm:$0xff]  }
 0x305   : > { %v3243_v25 = vpop.f32.mrf.mxu1 }
 0x306   : > { %1511 = vst.msk [vmem:[%s4290_s11 + $0x40] sm:$0xff] %vm1502_vm1, %v1408_v35  ;;  %v1419_v26 = vadd.f32 %v3243_v25, %v4285_v16  ;;  %v3498_v25 = vld [vmem:[#allocation7 + $0x34] ss:$8 sps:$4 sm:$0xff]  }
 0x307   : > { %v1410_v28 = vpop.f32.mrf.mxu1 }
 0x308   : > { %1514 = vst.msk [vmem:[%s4290_s11 + $0x58] sm:$0xff] %vm1502_vm1, %v1419_v26  ;;  %v1411_v31 = vadd.f32 %v4285_v16, %v1410_v28  ;;  %v1540_v33 = vpack.c.bf16 %v1419_v26, %v1416_v27  ;;  %v3492_v27 = vld [vmem:[#allocation7 + $0x54] ss:$8 sps:$4 sm:$0xff]   ;;  %v3496_v26 = vld [vmem:[#allocation7 + $0x30] ss:$8 sps:$4 sm:$0xff]  }
 0x309   : > { %2239 = vmatprep.subr.bf16.mxu0 %v3492_v27  ;;  %v3501_v28 = vld [vmem:[#allocation7 + $0x24] ss:$8 sps:$4 sm:$0xff]  }
 0x30a   : > { %1512 = vst.msk [vmem:[%s4290_s11 + $0x48] sm:$0xff] %vm1502_vm1, %v1411_v31  ;;  %v1539_v32 = vpack.c.bf16 %v1411_v31, %v1408_v35  ;;  %v3495_v35 = vld [vmem:[#allocation7 + $0x44] ss:$8 sps:$4 sm:$0xff]   ;;  %2240 = vmatpush1.bf16.msra.mxu0 %v3490_v30  ;;  %v3499_v31 = vld [vmem:[#allocation7 + $0x20] ss:$8 sps:$4 sm:$0xff]  }
 0x30b   : > { %2241 = vmatprep.subr.bf16.mxu0 %v3495_v35 }
 0x30c   : > { %3288 = vmatprep.mubr.bf16.mxu0 %v1539_v32  ;;  %v3504_v32 = vld [vmem:[#allocation7 + $0x14] ss:$8 sps:$4 sm:$0xff]  }
 0x30d   : > { %3289 = vmatmul.mubr.bf16.gmra.mxu0 %v1540_v33  ;;  %v3502_v33 = vld [vmem:[#allocation7 + $0x10] ss:$8 sps:$4 sm:$0xff]  }
 0x311   : > { %v3246_v34 = vpop.f32.mrf.mxu1 }
 0x312   : > { %v1432_v36 = vadd.f32 %v3246_v34, %v4285_v16 }
 0x313   : > { %v1423_v38 = vpop.f32.mrf.mxu1 }
 0x314   : > { %1517 = vst.msk [vmem:[%s4290_s11 + $0x70] sm:$0xff] %vm1502_vm1, %v1432_v36  ;;  %v1424_v44 = vadd.f32 %v4285_v16, %v1423_v38  ;;  %v4391_v38 = vld [vmem:[%s4657_s8] ss:$0 sm:$0xff] }
 0x315   : > { %v3247_v47 = vpop.f32.mrf.mxu1 }
 0x316   : > { %1515 = vst.msk [vmem:[%s4290_s11 + $0x60] sm:$0xff] %vm1502_vm1, %v1424_v44  ;;  %v1435_v52 = vadd.f32 %v3247_v47, %v4285_v16 }
 0x317   : > { %v1426_v37 = vpop.f32.mrf.mxu1 }
 0x318   : > { %1518 = vst.msk [vmem:[%s4290_s11 + $0x78] sm:$0xff] %vm1502_vm1, %v1435_v52  ;;  %v1427_v40 = vadd.f32 %v4285_v16, %v1426_v37  ;;  %v1542_v9 = vpack.c.bf16 %v1435_v52, %v1432_v36 }
 0x319   : > { %v3250_v55 = vpop.f32.mrf.mxu1 }
 0x31a   : > { %1516 = vst.msk [vmem:[%s4290_s11 + $0x68] sm:$0xff] %vm1502_vm1, %v1427_v40  ;;  %v1541_v63 = vpack.c.bf16 %v1427_v40, %v1424_v44  ;;  %v1448_v3 = vadd.f32 %v3250_v55, %v4285_v16 }
 0x31b   : > { %v1439_v41 = vpop.f32.mrf.mxu1 }
 0x31c   : > { %1521 = vst.msk [vmem:[%s4290_s11 + $0x90] sm:$0xff] %vm1502_vm1, %v1448_v3  ;;  %v1440_v42 = vadd.f32 %v4285_v16, %v1439_v41  ;;  %3292 = vmatprep.mubr.bf16.mxu0 %v1541_v63 }
 0x31d   : > { %v3251_v43 = vpop.f32.mrf.mxu1  ;;  %3293 = vmatmul.mubr.bf16.gmra.mxu0 %v1542_v9 }
 0x31e   : > { %1519 = vst.msk [vmem:[%s4290_s11 + $0x80] sm:$0xff] %vm1502_vm1, %v1440_v42  ;;  %v1451_v45 = vadd.f32 %v3251_v43, %v4285_v16 }
 0x31f   : > { %v1442_v46 = vpop.f32.mrf.mxu1 }
 0x320   : > { %1522 = vst.msk [vmem:[%s4290_s11 + $0x98] sm:$0xff] %vm1502_vm1, %v1451_v45  ;;  %v1443_v48 = vadd.f32 %v4285_v16, %v1442_v46  ;;  %v1544_v13 = vpack.c.bf16 %v1451_v45, %v1448_v3 }
 0x321   : > { %v3254_v50 = vpop.f32.mrf.mxu1 }
 0x322   : > { %1520 = vst.msk [vmem:[%s4290_s11 + $0x88] sm:$0xff] %vm1502_vm1, %v1443_v48  ;;  %v1543_v51 = vpack.c.bf16 %v1443_v48, %v1440_v42  ;;  %v1464_v53 = vadd.f32 %v3254_v50, %v4285_v16 }
 0x323   : > { %v1455_v21 = vpop.f32.mrf.mxu1 }
 0x324   : > { %1525 = vst.msk [vmem:[%s4290_s11 + $0xb0] sm:$0xff] %vm1502_vm1, %v1464_v53  ;;  %v1456_v29 = vadd.f32 %v4285_v16, %v1455_v21  ;;  %3296 = vmatprep.mubr.bf16.mxu0 %v1543_v51 }
 0x325   : > { %v3255_v39 = vpop.f32.mrf.mxu1  ;;  %3297 = vmatmul.mubr.bf16.gmra.mxu0 %v1544_v13 }
 0x326   : > { %1523 = vst.msk [vmem:[%s4290_s11 + $0xa0] sm:$0xff] %vm1502_vm1, %v1456_v29  ;;  %v1467_v54 = vadd.f32 %v3255_v39, %v4285_v16 }
 0x327   : > { %v1458_v49 = vpop.f32.mrf.mxu1 }
 0x328   : > { %1526 = vst.msk [vmem:[%s4290_s11 + $0xb8] sm:$0xff] %vm1502_vm1, %v1467_v54  ;;  %v1459_v56 = vadd.f32 %v4285_v16, %v1458_v49  ;;  %v1546_v1 = vpack.c.bf16 %v1467_v54, %v1464_v53 }
 0x329   : > { %v3258_v57 = vpop.f32.mrf.mxu1 }
 0x32a   : > { %1524 = vst.msk [vmem:[%s4290_s11 + $0xa8] sm:$0xff] %vm1502_vm1, %v1459_v56  ;;  %v1545_v59 = vpack.c.bf16 %v1459_v56, %v1456_v29  ;;  %v1480_v60 = vadd.f32 %v3258_v57, %v4285_v16 }
 0x32b   : > { %v1471_v2 = vpop.f32.mrf.mxu1 }
 0x32c   : > { %1529 = vst.msk [vmem:[%s4290_s11 + $0xd0] sm:$0xff] %vm1502_vm1, %v1480_v60  ;;  %v1472_v5 = vadd.f32 %v4285_v16, %v1471_v2  ;;  %3300 = vmatprep.mubr.bf16.mxu0 %v1545_v59 }
 0x32d   : > { %v3259_v58 = vpop.f32.mrf.mxu1  ;;  %3301 = vmatmul.mubr.bf16.gmra.mxu0 %v1546_v1 }
 0x32e   : > { %1527 = vst.msk [vmem:[%s4290_s11 + $0xc0] sm:$0xff] %vm1502_vm1, %v1472_v5  ;;  %v1483_v61 = vadd.f32 %v3259_v58, %v4285_v16 }
 0x32f   : > { %v1474_v0 = vpop.f32.mrf.mxu1 }
 0x330   : > { %1530 = vst.msk [vmem:[%s4290_s11 + $0xd8] sm:$0xff] %vm1502_vm1, %v1483_v61  ;;  %v1475_v62 = vadd.f32 %v4285_v16, %v1474_v0  ;;  %v1548_v4 = vpack.c.bf16 %v1483_v61, %v1480_v60 }
 0x331   : > { %v3262_v6 = vpop.f32.mrf.mxu1 }
 0x332   : > { %1528 = vst.msk [vmem:[%s4290_s11 + $0xc8] sm:$0xff] %vm1502_vm1, %v1475_v62  ;;  %v1547_v8 = vpack.c.bf16 %v1475_v62, %v1472_v5  ;;  %v1496_v10 = vadd.f32 %v3262_v6, %v4285_v16 }
 0x333   : > { %v1487_v11 = vpop.f32.mrf.mxu1 }
 0x334   : > { %1533 = vst.msk [vmem:[%s4290_s11 + $0xf0] sm:$0xff] %vm1502_vm1, %v1496_v10  ;;  %v1488_v14 = vadd.f32 %v4285_v16, %v1487_v11  ;;  %3304 = vmatprep.mubr.bf16.mxu0 %v1547_v8 }
 0x335   : > { %v3263_v7 = vpop.f32.mrf.mxu1  ;;  %3305 = vmatmul.mubr.bf16.gmra.mxu0 %v1548_v4 }
 0x336   : > { %1531 = vst.msk [vmem:[%s4290_s11 + $0xe0] sm:$0xff] %vm1502_vm1, %v1488_v14  ;;  %v1499_v12 = vadd.f32 %v3263_v7, %v4285_v16 }
 0x337   : > { %v1490_v15 = vpop.f32.mrf.mxu1 }
 0x338   : > { %1534 = vst.msk [vmem:[%s4290_s11 + $0xf8] sm:$0xff] %vm1502_vm1, %v1499_v12  ;;  %v1491_v19 = vadd.f32 %v4285_v16, %v1490_v15  ;;  %v1550_v17 = vpack.c.bf16 %v1499_v12, %v1496_v10  ;;  %v3493_v16 = vld [vmem:[#allocation7 + $0x40] ss:$8 sps:$4 sm:$0xff]  }
 0x339   : > { %2242 = vmatpush1.bf16.msra.mxu0 %v3493_v16 }
 0x33a   : > { %1532 = vst.msk [vmem:[%s4290_s11 + $0xe8] sm:$0xff] %vm1502_vm1, %v1491_v19  ;;  %v1549_v18 = vpack.c.bf16 %v1491_v19, %v1488_v14  ;;  %2243 = vmatprep.subr.bf16.mxu0 %v3498_v25  ;;  %s2690_s11 = scalar_lea.sflag [#allocation4], %s3936_s18 }
 0x33c   : > { %3308 = vmatprep.mubr.bf16.mxu0 %v1549_v18 }
 0x33d   : > { %3309 = vmatmul.mubr.bf16.gmra.mxu0 %v1550_v17 }
 0x33e   : > { %2244 = vmatpush1.bf16.msra.mxu0 %v3496_v26 }
 0x33f   : > { %2245 = vmatprep.subr.bf16.mxu0 %v3501_v28 }
 0x342   : > { %2246 = vmatpush1.bf16.msra.mxu0 %v3499_v31 }
 0x343   : > { %2247 = vmatprep.subr.bf16.mxu0 %v3504_v32 }
 0x346   : > { %2248 = vmatpush1.bf16.msra.mxu0 %v3502_v33 }
 0x3ad   : > { %v3282_v34 = vpop.f32.mrf.mxu0 }
 0x3ae   : > { %v1665_v37 = vadd.f32 %v3282_v34, %v4391_v38 }
 0x3af   : > { %v1656_v36 = vpop.f32.mrf.mxu0 }
 0x3b0   : > { %v1657_v47 = vadd.f32 %v4391_v38, %v1656_v36  ;;  %v1785_v41 = vmax.f32 %v1665_v37, 0.0 }
 0x3b1   : > { %v3283_v44 = vpop.f32.mrf.mxu0 }
 0x3b2   : > { %v1668_v52 = vadd.f32 %v3283_v44, %v4391_v38  ;;  %v1783_v3 = vmax.f32 %v1657_v47, 0.0 }
 0x3b3   : > { %v1659_v40 = vpop.f32.mrf.mxu0 }
 0x3b4   : > { %v1660_v55 = vadd.f32 %v4391_v38, %v1659_v40  ;;  %v1786_v63 = vmax.f32 %v1668_v52, 0.0 }
 0x3b6   : > { %v1784_v9 = vmax.f32 %v1660_v55, 0.0  ;;  %v1816_v43 = vpack.c.bf16 %v1786_v63, %v1785_v41 }
 0x3b8   : > { %v1815_v42 = vpack.c.bf16 %v1784_v9, %v1783_v3 }
 0x3ba   : > { %3320 = vmatprep.mubr.msk.bf16.mxu1 %vm1292_vm0, %v1815_v42 }
 0x3bb   : > { %3321 = vmatmul.mubr.msk.bf16.vlgmr.msra.gmra.mxu1 %vm1292_vm0, %v1816_v43 }
 0x3bd   : > { %v3286_v45 = vpop.f32.mrf.mxu0 }
 0x3be   : > { %v1681_v53 = vadd.f32 %v3286_v45, %v4391_v38 }
 0x3bf   : > { %v1672_v46 = vpop.f32.mrf.mxu0 }
 0x3c0   : > { %v1673_v50 = vadd.f32 %v4391_v38, %v1672_v46  ;;  %v1789_v49 = vmax.f32 %v1681_v53, 0.0 }
 0x3c1   : > { %v3287_v48 = vpop.f32.mrf.mxu0 }
 0x3c2   : > { %v1684_v51 = vadd.f32 %v3287_v48, %v4391_v38  ;;  %v1787_v39 = vmax.f32 %v1673_v50, 0.0 }
 0x3c3   : > { %v1675_v13 = vpop.f32.mrf.mxu0 }
 0x3c4   : > { %v1676_v21 = vadd.f32 %v4391_v38, %v1675_v13  ;;  %v1790_v29 = vmax.f32 %v1684_v51, 0.0 }
 0x3c6   : > { %v1788_v54 = vmax.f32 %v1676_v21, 0.0  ;;  %v1818_v57 = vpack.c.bf16 %v1790_v29, %v1789_v49 }
 0x3c8   : > { %v1817_v56 = vpack.c.bf16 %v1788_v54, %v1787_v39 }
 0x3ca   : > { %3324 = vmatprep.mubr.msk.bf16.mxu1 %vm1292_vm0, %v1817_v56 }
 0x3cb   : > { %3325 = vmatmul.mubr.msk.bf16.gmra.mxu1 %vm1292_vm0, %v1818_v57 }
 0x3cd   : > { %v3290_v59 = vpop.f32.mrf.mxu0 }
 0x3ce   : > { %v1697_v58 = vadd.f32 %v3290_v59, %v4391_v38 }
 0x3cf   : > { %v1688_v60 = vpop.f32.mrf.mxu0 }
 0x3d0   : > { %v1689_v2 = vadd.f32 %v4391_v38, %v1688_v60  ;;  %v1793_v8 = vmax.f32 %v1697_v58, 0.0 }
 0x3d1   : > { %v3291_v1 = vpop.f32.mrf.mxu0 }
 0x3d2   : > { %v1700_v5 = vadd.f32 %v3291_v1, %v4391_v38  ;;  %v1791_v4 = vmax.f32 %v1689_v2, 0.0 }
 0x3d3   : > { %v1691_v61 = vpop.f32.mrf.mxu0 }
 0x3d4   : > { %v1692_v0 = vadd.f32 %v4391_v38, %v1691_v61  ;;  %v1794_v62 = vmax.f32 %v1700_v5, 0.0 }
 0x3d6   : > { %v1792_v6 = vmax.f32 %v1692_v0, 0.0  ;;  %v1820_v11 = vpack.c.bf16 %v1794_v62, %v1793_v8 }
 0x3d8   : > { %v1819_v10 = vpack.c.bf16 %v1792_v6, %v1791_v4 }
 0x3da   : > { %3328 = vmatprep.mubr.msk.bf16.mxu1 %vm1292_vm0, %v1819_v10 }
 0x3db   : > { %3329 = vmatmul.mubr.msk.bf16.gmra.mxu1 %vm1292_vm0, %v1820_v11  ;;  %v3507_v11 = vld [vmem:[#allocation7 + $0x4] ss:$8 sps:$4 sm:$0xff]  }
 0x3dc   : > { %2249 = vmatprep.subr.bf16.mxu0 %v3507_v11 }
 0x3dd   : > { %v3294_v14 = vpop.f32.mrf.mxu0 }
 0x3de   : > { %v1713_v17 = vadd.f32 %v3294_v14, %v4391_v38 }
 0x3df   : > { %v1704_v7 = vpop.f32.mrf.mxu0 }
 0x3e0   : > { %v1705_v15 = vadd.f32 %v4391_v38, %v1704_v7  ;;  %v1797_v30 = vmax.f32 %v1713_v17, 0.0 }
 0x3e1   : > { %v3295_v12 = vpop.f32.mrf.mxu0 }
 0x3e2   : > { %v1716_v19 = vadd.f32 %v3295_v12, %v4391_v38  ;;  %v1795_v22 = vmax.f32 %v1705_v15, 0.0  ;;  %v3505_v12 = vld [vmem:[#allocation7] ss:$8 sps:$4 sm:$0xff]  }
 0x3e3   : > { %v1707_v18 = vpop.f32.mrf.mxu0  ;;  %2250 = vmatpush1.bf16.msra.mxu0 %v3505_v12 }
 0x3e4   : > { %v1708_v20 = vadd.f32 %v4391_v38, %v1707_v18  ;;  %v1798_v23 = vmax.f32 %v1716_v19, 0.0 }
 0x3e5   : > { %v3298_v24 = vpop.f32.mrf.mxu0 }
 0x3e6   : > { %v1796_v27 = vmax.f32 %v1708_v20, 0.0  ;;  %v1822_v25 = vpack.c.bf16 %v1798_v23, %v1797_v30  ;;  %v1729_v32 = vadd.f32 %v3298_v24, %v4391_v38  ;;  %v3731_v23 = vmov 0   ;;  %v4445_v30 = vld [vmem:[%s4659_s10] ss:$0 sm:$0xff] }
 0x3e7   : > { %v1720_v35 = vpop.f32.mrf.mxu0  ;;  %2267 = vmatprep.mubr.bf16.mxu0 %v3731_v23 }
 0x3e8   : > { %v1821_v16 = vpack.c.bf16 %v1796_v27, %v1795_v22  ;;  %v1721_v28 = vadd.f32 %v4391_v38, %v1720_v35  ;;  %v1801_v37 = vmax.f32 %v1729_v32, 0.0 }
 0x3e9   : > { %v3299_v26 = vpop.f32.mrf.mxu0 }
 0x3ea   : > { %v1732_v31 = vadd.f32 %v3299_v26, %v4391_v38  ;;  %3332 = vmatprep.mubr.msk.bf16.mxu1 %vm1292_vm0, %v1821_v16  ;;  %v1799_v47 = vmax.f32 %v1721_v28, 0.0 }
 0x3eb   : > { %v1723_v33 = vpop.f32.mrf.mxu0  ;;  %3333 = vmatmul.mubr.msk.bf16.gmra.mxu1 %vm1292_vm0, %v1822_v25 }
 0x3ec   : > { %v1724_v34 = vadd.f32 %v4391_v38, %v1723_v33  ;;  %v1802_v36 = vmax.f32 %v1732_v31, 0.0 }
 0x3ed   : > { %v3302_v44 = vpop.f32.mrf.mxu0 }
 0x3ee   : > { %v1800_v52 = vmax.f32 %v1724_v34, 0.0  ;;  %v1824_v63 = vpack.c.bf16 %v1802_v36, %v1801_v37  ;;  %v1745_v42 = vadd.f32 %v3302_v44, %v4391_v38 }
 0x3ef   : > { %v1736_v40 = vpop.f32.mrf.mxu0 }
 0x3f0   : > { %v1823_v55 = vpack.c.bf16 %v1800_v52, %v1799_v47  ;;  %v1737_v9 = vadd.f32 %v4391_v38, %v1736_v40  ;;  %v1805_v53 = vmax.f32 %v1745_v42, 0.0 }
 0x3f1   : > { %v3303_v3 = vpop.f32.mrf.mxu0 }
 0x3f2   : > { %v1748_v41 = vadd.f32 %v3303_v3, %v4391_v38  ;;  %3336 = vmatprep.mubr.msk.bf16.mxu1 %vm1292_vm0, %v1823_v55  ;;  %v1803_v50 = vmax.f32 %v1737_v9, 0.0 }
 0x3f3   : > { %v1739_v43 = vpop.f32.mrf.mxu0  ;;  %3337 = vmatmul.mubr.msk.bf16.gmra.mxu1 %vm1292_vm0, %v1824_v63 }
 0x3f4   : > { %v1740_v45 = vadd.f32 %v4391_v38, %v1739_v43  ;;  %v1806_v46 = vmax.f32 %v1748_v41, 0.0 }
 0x3f5   : > { %v3306_v48 = vpop.f32.mrf.mxu0 }
 0x3f6   : > { %v1804_v51 = vmax.f32 %v1740_v45, 0.0  ;;  %v1826_v29 = vpack.c.bf16 %v1806_v46, %v1805_v53  ;;  %v1761_v39 = vadd.f32 %v3306_v48, %v4391_v38 }
 0x3f7   : > { %v1752_v13 = vpop.f32.mrf.mxu0 }
 0x3f8   : > { %v1825_v21 = vpack.c.bf16 %v1804_v51, %v1803_v50  ;;  %v1753_v49 = vadd.f32 %v4391_v38, %v1752_v13  ;;  %v1809_v60 = vmax.f32 %v1761_v39, 0.0 }
 0x3f9   : > { %v3307_v54 = vpop.f32.mrf.mxu0 }
 0x3fa   : > { %v1764_v56 = vadd.f32 %v3307_v54, %v4391_v38  ;;  %3340 = vmatprep.mubr.msk.bf16.mxu1 %vm1292_vm0, %v1825_v21  ;;  %v1807_v5 = vmax.f32 %v1753_v49, 0.0 }
 0x3fb   : > { %v1755_v57 = vpop.f32.mrf.mxu0  ;;  %3341 = vmatmul.mubr.msk.bf16.gmra.mxu1 %vm1292_vm0, %v1826_v29 }
 0x3fc   : > { %v1756_v59 = vadd.f32 %v4391_v38, %v1755_v57  ;;  %v1810_v1 = vmax.f32 %v1764_v56, 0.0 }
 0x3fd   : > { %v3310_v2 = vpop.f32.mrf.mxu0 }
 0x3fe   : > { %v1808_v58 = vmax.f32 %v1756_v59, 0.0  ;;  %v1777_v61 = vadd.f32 %v3310_v2, %v4391_v38  ;;  %v1828_v6 = vpack.c.bf16 %v1810_v1, %v1809_v60 }
 0x3ff   : > { %v1768_v0 = vpop.f32.mrf.mxu0 }
 0x400   : > { %v1827_v62 = vpack.c.bf16 %v1808_v58, %v1807_v5  ;;  %v1769_v4 = vadd.f32 %v4391_v38, %v1768_v0  ;;  %v1813_v14 = vmax.f32 %v1777_v61, 0.0 }
 0x401   : > { %v3311_v8 = vpop.f32.mrf.mxu0 }
 0x402   : > { %v1780_v10 = vadd.f32 %v3311_v8, %v4391_v38  ;;  %3344 = vmatprep.mubr.msk.bf16.mxu1 %vm1292_vm0, %v1827_v62  ;;  %v1811_v15 = vmax.f32 %v1769_v4, 0.0 }
 0x403   : > { %v1771_v7 = vpop.f32.mrf.mxu0  ;;  %3345 = vmatmul.mubr.msk.bf16.gmra.mxu1 %vm1292_vm0, %v1828_v6 }
 0x404   : > { %v1814_v19 = vmax.f32 %v1780_v10, 0.0  ;;  %v1772_v17 = vadd.f32 %v4391_v38, %v1771_v7 }
 0x406   : > { %v1812_v18 = vmax.f32 %v1772_v17, 0.0  ;;  %v1830_v20 = vpack.c.bf16 %v1814_v19, %v1813_v14 }
 0x408   : > { %v1829_v24 = vpack.c.bf16 %v1812_v18, %v1811_v15 }
 0x40a   : > { %3348 = vmatprep.mubr.msk.bf16.mxu1 %vm1292_vm0, %v1829_v24 }
 0x40b   : > { %3349 = vmatmul.mubr.msk.bf16.gmra.mxu1 %vm1292_vm0, %v1830_v20 }
 0x47b   : > { %v3322_v22 = vpop.f32.mrf.mxu1 }
 0x47c   : > { %v1961_v33 = vadd.f32 %v3322_v22, %v4445_v30 }
 0x47d   : > { %v1952_v27 = vpop.f32.mrf.mxu1 }
 0x47e   : > { %v1953_v35 = vadd.f32 %v4445_v30, %v1952_v27  ;;  %v2081_v44 = vmax.f32 %v1961_v33, 0.0 }
 0x47f   : > { %v3323_v38 = vpop.f32.mrf.mxu1 }
 0x480   : > { %v2079_v26 = vmax.f32 %v1953_v35, 0.0  ;;  %v1964_v31 = vadd.f32 %v3323_v38, %v4445_v30 }
 0x481   : > { %v1955_v16 = vpop.f32.mrf.mxu1 }
 0x482   : > { %v1956_v25 = vadd.f32 %v4445_v30, %v1955_v16  ;;  %v2082_v34 = vmax.f32 %v1964_v31, 0.0 }
 0x484   : > { %v2080_v28 = vmax.f32 %v1956_v25, 0.0  ;;  %v2112_v52 = vpack.c.bf16 %v2082_v34, %v2081_v44 }
 0x486   : > { %v2111_v32 = vpack.c.bf16 %v2080_v28, %v2079_v26 }
 0x488   : > { %2268 = vmatmul.mubr.bf16.vlgmr.msra.gmra.mxu0 %v2111_v32 }
 0x489   : > { %2277 = vmatprep.mubr.bf16.mxu0 %v3731_v23 }
 0x48b   : > { %v3326_v36 = vpop.f32.mrf.mxu1 }
 0x48c   : > { %v1977_v43 = vadd.f32 %v3326_v36, %v4445_v30 }
 0x48d   : > { %v1968_v47 = vpop.f32.mrf.mxu1 }
 0x48e   : > { %v1969_v40 = vadd.f32 %v4445_v30, %v1968_v47  ;;  %v2085_v48 = vmax.f32 %v1977_v43, 0.0 }
 0x48f   : > { %v3327_v37 = vpop.f32.mrf.mxu1 }
 0x490   : > { %2278 = vmatmul.mubr.bf16.gmra.mxu0 %v2112_v52  ;;  %v2083_v3 = vmax.f32 %v1969_v40, 0.0  ;;  %v1980_v41 = vadd.f32 %v3327_v37, %v4445_v30 }
 0x491   : > { %v1971_v55 = vpop.f32.mrf.mxu1  ;;  %2287 = vmatprep.mubr.bf16.mxu0 %v3731_v23 }
 0x492   : > { %v1972_v63 = vadd.f32 %v4445_v30, %v1971_v55  ;;  %v2086_v45 = vmax.f32 %v1980_v41, 0.0 }
 0x494   : > { %v2084_v9 = vmax.f32 %v1972_v63, 0.0  ;;  %v2114_v51 = vpack.c.bf16 %v2086_v45, %v2085_v48 }
 0x496   : > { %v2113_v42 = vpack.c.bf16 %v2084_v9, %v2083_v3 }
 0x498   : > { %2288 = vmatmul.mubr.bf16.gmra.mxu0 %v2113_v42 }
 0x499   : > { %2297 = vmatprep.mubr.bf16.mxu0 %v3731_v23 }
 0x49b   : > { %v3330_v46 = vpop.f32.mrf.mxu1 }
 0x49c   : > { %v1993_v57 = vadd.f32 %v3330_v46, %v4445_v30 }
 0x49d   : > { %v1984_v50 = vpop.f32.mrf.mxu1 }
 0x49e   : > { %v1985_v13 = vadd.f32 %v4445_v30, %v1984_v50  ;;  %v2089_v1 = vmax.f32 %v1993_v57, 0.0 }
 0x49f   : > { %v3331_v53 = vpop.f32.mrf.mxu1 }
 0x4a0   : > { %2298 = vmatmul.mubr.bf16.gmra.mxu0 %v2114_v51  ;;  %v2087_v39 = vmax.f32 %v1985_v13, 0.0  ;;  %v1996_v49 = vadd.f32 %v3331_v53, %v4445_v30 }
 0x4a1   : > { %v1987_v21 = vpop.f32.mrf.mxu1  ;;  %2307 = vmatprep.mubr.bf16.mxu0 %v3731_v23 }
 0x4a2   : > { %v1988_v29 = vadd.f32 %v4445_v30, %v1987_v21  ;;  %v2090_v59 = vmax.f32 %v1996_v49, 0.0 }
 0x4a4   : > { %v2088_v54 = vmax.f32 %v1988_v29, 0.0  ;;  %v2116_v5 = vpack.c.bf16 %v2090_v59, %v2089_v1 }
 0x4a6   : > { %v2115_v56 = vpack.c.bf16 %v2088_v54, %v2087_v39 }
 0x4a8   : > { %2308 = vmatmul.mubr.bf16.gmra.mxu0 %v2115_v56 }
 0x4a9   : > { %2317 = vmatprep.mubr.bf16.mxu0 %v3731_v23 }
 0x4ab   : > { %v3334_v60 = vpop.f32.mrf.mxu1 }
 0x4ac   : > { %v2009_v12 = vadd.f32 %v3334_v60, %v4445_v30 }
 0x4ad   : > { %v2000_v2 = vpop.f32.mrf.mxu1 }
 0x4ae   : > { %v2001_v61 = vadd.f32 %v4445_v30, %v2000_v2  ;;  %v2093_v17 = vmax.f32 %v2009_v12, 0.0 }
 0x4af   : > { %v3335_v58 = vpop.f32.mrf.mxu1 }
 0x4b0   : > { %2318 = vmatmul.mubr.bf16.gmra.mxu0 %v2116_v5  ;;  %v2091_v6 = vmax.f32 %v2001_v61, 0.0  ;;  %v2012_v11 = vadd.f32 %v3335_v58, %v4445_v30 }
 0x4b1   : > { %v2003_v0 = vpop.f32.mrf.mxu1  ;;  %2327 = vmatprep.mubr.bf16.mxu0 %v3731_v23 }
 0x4b2   : > { %v2004_v62 = vadd.f32 %v4445_v30, %v2003_v0  ;;  %v2094_v15 = vmax.f32 %v2012_v11, 0.0 }
 0x4b3   : > { %v3338_v4 = vpop.f32.mrf.mxu1 }
 0x4b4   : > { %v2092_v8 = vmax.f32 %v2004_v62, 0.0  ;;  %v2118_v18 = vpack.c.bf16 %v2094_v15, %v2093_v17  ;;  %v2025_v28 = vadd.f32 %v3338_v4, %v4445_v30 }
 0x4b5   : > { %v2016_v10 = vpop.f32.mrf.mxu1 }
 0x4b6   : > { %v2117_v14 = vpack.c.bf16 %v2092_v8, %v2091_v6  ;;  %v2017_v22 = vadd.f32 %v4445_v30, %v2016_v10  ;;  %v2097_v33 = vmax.f32 %v2025_v28, 0.0  ;;  %v2145_v8 = vlaneseq }
 0x4b7   : > { %v3339_v7 = vpop.f32.mrf.mxu1 }
 0x4b8   : > { %2328 = vmatmul.mubr.bf16.gmra.mxu0 %v2117_v14  ;;  %v2095_v35 = vmax.f32 %v2017_v22, 0.0  ;;  %v2028_v16 = vadd.f32 %v3339_v7, %v4445_v30  ;;  %v2146_v10 = vshrl.u32 %v2145_v8, 7  ;;  %v2143_v14 = vld [vmem:[%s4661_s12] sm:$0x3] }
 0x4b9   : > { %2337 = vmatprep.mubr.bf16.mxu0 %v3731_v23  ;;  %v2019_v19 = vpop.f32.mrf.mxu1 }
 0x4ba   : > { %v2020_v20 = vadd.f32 %v4445_v30, %v2019_v19  ;;  %v2098_v31 = vmax.f32 %v2028_v16, 0.0  ;;  %v2147_v11 = vsub.s32 0, %v2146_v10  ;;  %v2151_v7 = vsub.s32 1, %v2146_v10 }
 0x4bb   : > { %v3342_v24 = vpop.f32.mrf.mxu1 }
 0x4bc   : > { %v2096_v27 = vmax.f32 %v2020_v20, 0.0  ;;  %v2120_v34 = vpack.c.bf16 %v2098_v31, %v2097_v33  ;;  %v2041_v9 = vadd.f32 %v3342_v24, %v4445_v30  ;;  %v4497_v15 = vrot.slane %v2143_v14, %v2147_v11 }
 0x4bd   : > { %v2032_v38 = vpop.f32.mrf.mxu1  ;;  %v4499_v19 = vrot.slane %v2143_v14, %v2151_v7 }
 0x4be   : > { %v2119_v25 = vpack.c.bf16 %v2096_v27, %v2095_v35  ;;  %v2033_v47 = vadd.f32 %v4445_v30, %v2032_v38  ;;  %v2101_v43 = vmax.f32 %v2041_v9, 0.0 }
 0x4bf   : > { %v3343_v26 = vpop.f32.mrf.mxu1 }
 0x4c0   : > { %2338 = vmatmul.mubr.bf16.gmra.mxu0 %v2118_v18  ;;  %v2099_v40 = vmax.f32 %v2033_v47, 0.0  ;;  %v2044_v55 = vadd.f32 %v3343_v26, %v4445_v30 }
 0x4c1   : > { %2347 = vmatprep.mubr.bf16.mxu0 %v3731_v23  ;;  %v2035_v32 = vpop.f32.mrf.mxu1 }
 0x4c2   : > { %v2036_v36 = vadd.f32 %v4445_v30, %v2035_v32  ;;  %v2102_v41 = vmax.f32 %v2044_v55, 0.0 }
 0x4c3   : > { %v3346_v44 = vpop.f32.mrf.mxu1 }
 0x4c4   : > { %v2100_v52 = vmax.f32 %v2036_v36, 0.0  ;;  %v2122_v45 = vpack.c.bf16 %v2102_v41, %v2101_v43  ;;  %v2057_v54 = vadd.f32 %v3346_v44, %v4445_v30 }
 0x4c5   : > { %v2048_v37 = vpop.f32.mrf.mxu1 }
 0x4c6   : > { %v2121_v63 = vpack.c.bf16 %v2100_v52, %v2099_v40  ;;  %v2049_v50 = vadd.f32 %v4445_v30, %v2048_v37  ;;  %v2105_v57 = vmax.f32 %v2057_v54, 0.0 }
 0x4c7   : > { %v3347_v3 = vpop.f32.mrf.mxu1 }
 0x4c8   : > { %2348 = vmatmul.mubr.bf16.gmra.mxu0 %v2119_v25  ;;  %v2103_v13 = vmax.f32 %v2049_v50, 0.0  ;;  %v2060_v21 = vadd.f32 %v3347_v3, %v4445_v30 }
 0x4c9   : > { %2357 = vmatprep.mubr.bf16.mxu0 %v3731_v23  ;;  %v2051_v42 = vpop.f32.mrf.mxu1 }
 0x4ca   : > { %v2052_v46 = vadd.f32 %v4445_v30, %v2051_v42  ;;  %v2106_v49 = vmax.f32 %v2060_v21, 0.0 }
 0x4cb   : > { %v3350_v48 = vpop.f32.mrf.mxu1 }
 0x4cc   : > { %v2104_v51 = vmax.f32 %v2052_v46, 0.0  ;;  %v2124_v59 = vpack.c.bf16 %v2106_v49, %v2105_v57  ;;  %v2073_v58 = vadd.f32 %v3350_v48, %v4445_v30 }
 0x4cd   : > { %v2064_v53 = vpop.f32.mrf.mxu1 }
 0x4ce   : > { %v2123_v29 = vpack.c.bf16 %v2104_v51, %v2103_v13  ;;  %v2065_v60 = vadd.f32 %v4445_v30, %v2064_v53  ;;  %v2109_v62 = vmax.f32 %v2073_v58, 0.0 }
 0x4cf   : > { %v3351_v39 = vpop.f32.mrf.mxu1 }
 0x4d0   : > { %2358 = vmatmul.mubr.bf16.gmra.mxu0 %v2120_v34  ;;  %v2107_v2 = vmax.f32 %v2065_v60, 0.0  ;;  %v2076_v61 = vadd.f32 %v3351_v39, %v4445_v30 }
 0x4d1   : > { %2367 = vmatprep.mubr.bf16.mxu0 %v3731_v23  ;;  %v2067_v56 = vpop.f32.mrf.mxu1 }
 0x4d2   : > { %v2068_v1 = vadd.f32 %v4445_v30, %v2067_v56  ;;  %v2110_v4 = vmax.f32 %v2076_v61, 0.0 }
 0x4d4   : > { %v2108_v5 = vmax.f32 %v2068_v1, 0.0  ;;  %v2126_v6 = vpack.c.bf16 %v2110_v4, %v2109_v62 }
 0x4d6   : > { %v2125_v0 = vpack.c.bf16 %v2108_v5, %v2107_v2 }
 0x4d8   : > { %2368 = vmatmul.mubr.bf16.gmra.mxu0 %v2121_v63 }
 0x4d9   : > { %2377 = vmatprep.mubr.bf16.mxu0 %v3731_v23 }
 0x4e0   : > { %2378 = vmatmul.mubr.bf16.gmra.mxu0 %v2122_v45 }
 0x4e1   : > { %2387 = vmatprep.mubr.bf16.mxu0 %v3731_v23 }
 0x4e8   : > { %2388 = vmatmul.mubr.bf16.gmra.mxu0 %v2123_v29 }
 0x4e9   : > { %2397 = vmatprep.mubr.bf16.mxu0 %v3731_v23 }
 0x4f0   : > { %2398 = vmatmul.mubr.bf16.gmra.mxu0 %v2124_v59 }
 0x4f1   : > { %2407 = vmatprep.mubr.bf16.mxu0 %v3731_v23 }
 0x4f8   : > { %2408 = vmatmul.mubr.bf16.gmra.mxu0 %v2125_v0 }
 0x4f9   : > { %2417 = vmatprep.mubr.bf16.mxu0 %v3731_v23 }
 0x500   : > { %2418 = vmatmul.mubr.bf16.gmra.mxu0 %v2126_v6 }
 0x548   : > { %v2269_v12 = vpop.f32.mrf.mxu0 }
 0x549   : > { %v2270_v23 = vadd.f32 %v2269_v12, %v4497_v15 }
 0x54a   : > { %v2271_v30 = vpop.f32.mrf.mxu0 }
 0x54b   : > { %v2272_v24 = vadd.f32 %v2271_v30, %v4499_v19 }
 0x54c   : > { %v2273_v17 = vpop.f32.mrf.mxu0 }
 0x54d   : > { %v2274_v18 = vadd.f32 %v2273_v17, %v4497_v15 }
 0x54e   : > { %v2275_v20 = vpop.f32.mrf.mxu0 }
 0x54f   : > { %v2428_v22 = vpack.c.bf16 %v2274_v18, %v2270_v23  ;;  %v2276_v27 = vadd.f32 %v2275_v20, %v4499_v19 }
 0x550   : > { %v2279_v38 = vpop.f32.mrf.mxu0 }
 0x551   : > { %v2429_v35 = vpack.c.bf16 %v2276_v27, %v2272_v24  ;;  %3508 = vtanh.bf16 %v2428_v22  ;;  %v2280_v26 = vadd.f32 %v2279_v38, %v4497_v15 }
 0x552   : > { %v2281_v16 = vpop.f32.mrf.mxu0 }
 0x553   : > { %3510 = vtanh.bf16 %v2429_v35  ;;  %v2282_v32 = vadd.f32 %v2281_v16, %v4499_v19 }
 0x554   : > { %v2283_v25 = vpop.f32.mrf.mxu0 }
 0x555   : > { %v2284_v28 = vadd.f32 %v2283_v25, %v4497_v15 }
 0x556   : > { %v2285_v31 = vpop.f32.mrf.mxu0 }
 0x557   : > { %v2430_v33 = vpack.c.bf16 %v2284_v28, %v2280_v26  ;;  %v2286_v34 = vadd.f32 %v2285_v31, %v4499_v19 }
 0x558   : > { %v2289_v36 = vpop.f32.mrf.mxu0 }
 0x559   : > { %v2431_v44 = vpack.c.bf16 %v2286_v34, %v2282_v32  ;;  %3512 = vtanh.bf16 %v2430_v33  ;;  %v2290_v37 = vadd.f32 %v2289_v36, %v4497_v15 }
 0x55a   : > { %v2291_v47 = vpop.f32.mrf.mxu0 }
 0x55b   : > { %3514 = vtanh.bf16 %v2431_v44  ;;  %v2292_v63 = vadd.f32 %v2291_v47, %v4499_v19 }
 0x55c   : > { %v2293_v52 = vpop.f32.mrf.mxu0 }
 0x55d   : > { %v2294_v40 = vadd.f32 %v2293_v52, %v4497_v15 }
 0x55e   : > { %v2295_v55 = vpop.f32.mrf.mxu0 }
 0x55f   : > { %v2432_v3 = vpack.c.bf16 %v2294_v40, %v2290_v37  ;;  %v2296_v9 = vadd.f32 %v2295_v55, %v4499_v19  ;;  %v3509_v41 = vpop.eup %3508 }
 0x560   : > { %v2299_v42 = vpop.f32.mrf.mxu0 }
 0x561   : > { %v3511_v43 = vpop.eup %3510  ;;  %v2433_v45 = vpack.c.bf16 %v2296_v9, %v2292_v63  ;;  %3516 = vtanh.bf16 %v2432_v3  ;;  %v2300_v53 = vadd.f32 %v2299_v42, %v4497_v15 }
 0x562   : > { %v2934_v46 = vcombine.low %v3509_v41, %v3511_v43  ;;  %v2935_v48 = vcombine.high %v3509_v41, %v3511_v43  ;;  %v2301_v50 = vpop.f32.mrf.mxu0 }
 0x563   : > { %3518 = vtanh.bf16 %v2433_v45  ;;  %v2302_v29 = vadd.f32 %v2301_v50, %v4499_v19 }
 0x564   : > { %2652 = vst [vmem:[%s4514_s15] sm:$0xff] %v2934_v46  ;;  %2653 = vst [vmem:[%s4514_s15 + $0x8] sm:$0xff] %v2935_v48  ;;  %v2303_v51 = vpop.f32.mrf.mxu0 }
 0x565   : > { %v2304_v13 = vadd.f32 %v2303_v51, %v4497_v15 }
 0x566   : > { %v2305_v21 = vpop.f32.mrf.mxu0 }
 0x567   : > { %v2434_v39 = vpack.c.bf16 %v2304_v13, %v2300_v53  ;;  %v2306_v54 = vadd.f32 %v2305_v21, %v4499_v19  ;;  %v3513_v49 = vpop.eup %3512 }
 0x568   : > { %v2309_v56 = vpop.f32.mrf.mxu0 }
 0x569   : > { %v3515_v57 = vpop.eup %3514  ;;  %v2435_v59 = vpack.c.bf16 %v2306_v54, %v2302_v29  ;;  %3520 = vtanh.bf16 %v2434_v39  ;;  %v2310_v58 = vadd.f32 %v2309_v56, %v4497_v15 }
 0x56a   : > { %v2936_v60 = vcombine.low %v3513_v49, %v3515_v57  ;;  %v2937_v1 = vcombine.high %v3513_v49, %v3515_v57  ;;  %v2311_v2 = vpop.f32.mrf.mxu0 }
 0x56b   : > { %3522 = vtanh.bf16 %v2435_v59  ;;  %v2312_v62 = vadd.f32 %v2311_v2, %v4499_v19 }
 0x56c   : > { %2654 = vst [vmem:[%s4514_s15 + $0x10] sm:$0xff] %v2936_v60  ;;  %2655 = vst [vmem:[%s4514_s15 + $0x18] sm:$0xff] %v2937_v1  ;;  %v2313_v5 = vpop.f32.mrf.mxu0 }
 0x56d   : > { %v2314_v61 = vadd.f32 %v2313_v5, %v4497_v15 }
 0x56e   : > { %v2315_v0 = vpop.f32.mrf.mxu0 }
 0x56f   : > { %v2436_v4 = vpack.c.bf16 %v2314_v61, %v2310_v58  ;;  %v2316_v6 = vadd.f32 %v2315_v0, %v4499_v19  ;;  %v3517_v8 = vpop.eup %3516 }
 0x570   : > { %v2319_v10 = vpop.f32.mrf.mxu0 }
 0x571   : > { %v3519_v11 = vpop.eup %3518  ;;  %v2437_v14 = vpack.c.bf16 %v2316_v6, %v2312_v62  ;;  %3524 = vtanh.bf16 %v2436_v4  ;;  %v2320_v23 = vadd.f32 %v2319_v10, %v4497_v15 }
 0x572   : > { %v2938_v7 = vcombine.low %v3517_v8, %v3519_v11  ;;  %v2939_v12 = vcombine.high %v3517_v8, %v3519_v11  ;;  %v2321_v30 = vpop.f32.mrf.mxu0 }
 0x573   : > { %3526 = vtanh.bf16 %v2437_v14  ;;  %v2322_v24 = vadd.f32 %v2321_v30, %v4499_v19 }
 0x574   : > { %2656 = vst [vmem:[%s4514_s15 + $0x20] sm:$0xff] %v2938_v7  ;;  %2657 = vst [vmem:[%s4514_s15 + $0x28] sm:$0xff] %v2939_v12  ;;  %v2323_v17 = vpop.f32.mrf.mxu0 }
 0x575   : > { %v2324_v18 = vadd.f32 %v2323_v17, %v4497_v15 }
 0x576   : > { %v2325_v20 = vpop.f32.mrf.mxu0 }
 0x577   : > { %v2438_v22 = vpack.c.bf16 %v2324_v18, %v2320_v23  ;;  %v2326_v27 = vadd.f32 %v2325_v20, %v4499_v19  ;;  %v3521_v38 = vpop.eup %3520 }
 0x578   : > { %v2329_v35 = vpop.f32.mrf.mxu0 }
 0x579   : > { %v3523_v16 = vpop.eup %3522  ;;  %v2439_v25 = vpack.c.bf16 %v2326_v27, %v2322_v24  ;;  %3528 = vtanh.bf16 %v2438_v22  ;;  %v2330_v33 = vadd.f32 %v2329_v35, %v4497_v15 }
 0x57a   : > { %v2940_v26 = vcombine.low %v3521_v38, %v3523_v16  ;;  %v2941_v28 = vcombine.high %v3521_v38, %v3523_v16  ;;  %v2331_v31 = vpop.f32.mrf.mxu0 }
 0x57b   : > { %3530 = vtanh.bf16 %v2439_v25  ;;  %v2332_v44 = vadd.f32 %v2331_v31, %v4499_v19 }
 0x57c   : > { %2658 = vst [vmem:[%s4514_s15 + $0x30] sm:$0xff] %v2940_v26  ;;  %2659 = vst [vmem:[%s4514_s15 + $0x38] sm:$0xff] %v2941_v28  ;;  %v2333_v32 = vpop.f32.mrf.mxu0 }
 0x57d   : > { %v2334_v34 = vadd.f32 %v2333_v32, %v4497_v15 }
 0x57e   : > { %v2335_v36 = vpop.f32.mrf.mxu0 }
 0x57f   : > { %v2440_v47 = vpack.c.bf16 %v2334_v34, %v2330_v33  ;;  %v2336_v52 = vadd.f32 %v2335_v36, %v4499_v19  ;;  %v3525_v37 = vpop.eup %3524 }
 0x580   : > { %v2339_v40 = vpop.f32.mrf.mxu0 }
 0x581   : > { %v3527_v55 = vpop.eup %3526  ;;  %v2441_v63 = vpack.c.bf16 %v2336_v52, %v2332_v44  ;;  %3532 = vtanh.bf16 %v2440_v47  ;;  %v2340_v43 = vadd.f32 %v2339_v40, %v4497_v15 }
 0x582   : > { %v2942_v3 = vcombine.low %v3525_v37, %v3527_v55  ;;  %v2943_v9 = vcombine.high %v3525_v37, %v3527_v55  ;;  %v2341_v41 = vpop.f32.mrf.mxu0 }
 0x583   : > { %3534 = vtanh.bf16 %v2441_v63  ;;  %v2342_v48 = vadd.f32 %v2341_v41, %v4499_v19 }
 0x584   : > { %2660 = vst [vmem:[%s4514_s15 + $0x40] sm:$0xff] %v2942_v3  ;;  %2661 = vst [vmem:[%s4514_s15 + $0x48] sm:$0xff] %v2943_v9  ;;  %v2343_v42 = vpop.f32.mrf.mxu0 }
 0x585   : > { %v2344_v45 = vadd.f32 %v2343_v42, %v4497_v15 }
 0x586   : > { %v2345_v46 = vpop.f32.mrf.mxu0 }
 0x587   : > { %v2442_v50 = vpack.c.bf16 %v2344_v45, %v2340_v43  ;;  %v2346_v51 = vadd.f32 %v2345_v46, %v4499_v19  ;;  %v3529_v53 = vpop.eup %3528 }
 0x588   : > { %v2349_v13 = vpop.f32.mrf.mxu0 }
 0x589   : > { %v3531_v21 = vpop.eup %3530  ;;  %v2443_v29 = vpack.c.bf16 %v2346_v51, %v2342_v48  ;;  %3536 = vtanh.bf16 %v2442_v50  ;;  %v2350_v57 = vadd.f32 %v2349_v13, %v4497_v15 }
 0x58a   : > { %v2944_v39 = vcombine.low %v3529_v53, %v3531_v21  ;;  %v2945_v54 = vcombine.high %v3529_v53, %v3531_v21  ;;  %v2351_v49 = vpop.f32.mrf.mxu0 }
 0x58b   : > { %3538 = vtanh.bf16 %v2443_v29  ;;  %v2352_v1 = vadd.f32 %v2351_v49, %v4499_v19 }
 0x58c   : > { %2662 = vst [vmem:[%s4514_s15 + $0x50] sm:$0xff] %v2944_v39  ;;  %2663 = vst [vmem:[%s4514_s15 + $0x58] sm:$0xff] %v2945_v54  ;;  %v2353_v56 = vpop.f32.mrf.mxu0 }
 0x58d   : > { %v2354_v59 = vadd.f32 %v2353_v56, %v4497_v15 }
 0x58e   : > { %v2355_v60 = vpop.f32.mrf.mxu0 }
 0x58f   : > { %v2444_v2 = vpack.c.bf16 %v2354_v59, %v2350_v57  ;;  %v2356_v5 = vadd.f32 %v2355_v60, %v4499_v19  ;;  %v3533_v58 = vpop.eup %3532 }
 0x590   : > { %v2359_v61 = vpop.f32.mrf.mxu0 }
 0x591   : > { %v3535_v0 = vpop.eup %3534  ;;  %v2445_v62 = vpack.c.bf16 %v2356_v5, %v2352_v1  ;;  %3540 = vtanh.bf16 %v2444_v2  ;;  %v2360_v11 = vadd.f32 %v2359_v61, %v4497_v15 }
 0x592   : > { %v2946_v4 = vcombine.low %v3533_v58, %v3535_v0  ;;  %v2947_v6 = vcombine.high %v3533_v58, %v3535_v0  ;;  %v2361_v8 = vpop.f32.mrf.mxu0 }
 0x593   : > { %3542 = vtanh.bf16 %v2445_v62  ;;  %v2362_v12 = vadd.f32 %v2361_v8, %v4499_v19 }
 0x594   : > { %2664 = vst [vmem:[%s4514_s15 + $0x60] sm:$0xff] %v2946_v4  ;;  %2665 = vst [vmem:[%s4514_s15 + $0x68] sm:$0xff] %v2947_v6  ;;  %v2363_v10 = vpop.f32.mrf.mxu0 }
 0x595   : > { %v2364_v14 = vadd.f32 %v2363_v10, %v4497_v15 }
 0x596   : > { %v2365_v7 = vpop.f32.mrf.mxu0 }
 0x597   : > { %v2446_v30 = vpack.c.bf16 %v2364_v14, %v2360_v11  ;;  %v2366_v17 = vadd.f32 %v2365_v7, %v4499_v19  ;;  %v3537_v23 = vpop.eup %3536 }
 0x598   : > { %v2369_v18 = vpop.f32.mrf.mxu0 }
 0x599   : > { %v3539_v20 = vpop.eup %3538  ;;  %v2447_v24 = vpack.c.bf16 %v2366_v17, %v2362_v12  ;;  %3544 = vtanh.bf16 %v2446_v30  ;;  %v2370_v16 = vadd.f32 %v2369_v18, %v4497_v15 }
 0x59a   : > { %v2948_v22 = vcombine.low %v3537_v23, %v3539_v20  ;;  %v2949_v27 = vcombine.high %v3537_v23, %v3539_v20  ;;  %v2371_v38 = vpop.f32.mrf.mxu0 }
 0x59b   : > { %3546 = vtanh.bf16 %v2447_v24  ;;  %v2372_v28 = vadd.f32 %v2371_v38, %v4499_v19 }
 0x59c   : > { %2666 = vst [vmem:[%s4514_s15 + $0x70] sm:$0xff] %v2948_v22  ;;  %2667 = vst [vmem:[%s4514_s15 + $0x78] sm:$0xff] %v2949_v27  ;;  %v2373_v35 = vpop.f32.mrf.mxu0 }
 0x59d   : > { %v2374_v25 = vadd.f32 %v2373_v35, %v4497_v15 }
 0x59e   : > { %v2375_v26 = vpop.f32.mrf.mxu0 }
 0x59f   : > { %v2448_v31 = vpack.c.bf16 %v2374_v25, %v2370_v16  ;;  %v2376_v32 = vadd.f32 %v2375_v26, %v4499_v19  ;;  %v3541_v33 = vpop.eup %3540 }
 0x5a0   : > { %v2379_v34 = vpop.f32.mrf.mxu0 }
 0x5a1   : > { %v3543_v36 = vpop.eup %3542  ;;  %v2449_v44 = vpack.c.bf16 %v2376_v32, %v2372_v28  ;;  %3548 = vtanh.bf16 %v2448_v31  ;;  %v2380_v55 = vadd.f32 %v2379_v34, %v4497_v15 }
 0x5a2   : > { %v2950_v47 = vcombine.low %v3541_v33, %v3543_v36  ;;  %v2951_v52 = vcombine.high %v3541_v33, %v3543_v36  ;;  %v2381_v37 = vpop.f32.mrf.mxu0 }
 0x5a3   : > { %3550 = vtanh.bf16 %v2449_v44  ;;  %v2382_v9 = vadd.f32 %v2381_v37, %v4499_v19 }
 0x5a4   : > { %2668 = vst [vmem:[%s4514_s15 + $0x80] sm:$0xff] %v2950_v47  ;;  %2669 = vst [vmem:[%s4514_s15 + $0x88] sm:$0xff] %v2951_v52  ;;  %v2383_v40 = vpop.f32.mrf.mxu0 }
 0x5a5   : > { %v2384_v63 = vadd.f32 %v2383_v40, %v4497_v15 }
 0x5a6   : > { %v2385_v3 = vpop.f32.mrf.mxu0 }
 0x5a7   : > { %v2450_v41 = vpack.c.bf16 %v2384_v63, %v2380_v55  ;;  %v2386_v42 = vadd.f32 %v2385_v3, %v4499_v19  ;;  %v3545_v43 = vpop.eup %3544 }
 0x5a8   : > { %v2389_v45 = vpop.f32.mrf.mxu0 }
 0x5a9   : > { %v3547_v46 = vpop.eup %3546  ;;  %v2451_v48 = vpack.c.bf16 %v2386_v42, %v2382_v9  ;;  %3552 = vtanh.bf16 %v2450_v41  ;;  %v2390_v21 = vadd.f32 %v2389_v45, %v4497_v15 }
 0x5aa   : > { %v2952_v50 = vcombine.low %v3545_v43, %v3547_v46  ;;  %v2953_v51 = vcombine.high %v3545_v43, %v3547_v46  ;;  %v2391_v53 = vpop.f32.mrf.mxu0 }
 0x5ab   : > { %3554 = vtanh.bf16 %v2451_v48  ;;  %v2392_v54 = vadd.f32 %v2391_v53, %v4499_v19 }
 0x5ac   : > { %2670 = vst [vmem:[%s4514_s15 + $0x90] sm:$0xff] %v2952_v50  ;;  %2671 = vst [vmem:[%s4514_s15 + $0x98] sm:$0xff] %v2953_v51  ;;  %v2393_v13 = vpop.f32.mrf.mxu0 }
 0x5ad   : > { %v2394_v29 = vadd.f32 %v2393_v13, %v4497_v15 }
 0x5ae   : > { %v2395_v39 = vpop.f32.mrf.mxu0 }
 0x5af   : > { %v2452_v49 = vpack.c.bf16 %v2394_v29, %v2390_v21  ;;  %v2396_v56 = vadd.f32 %v2395_v39, %v4499_v19  ;;  %v3549_v57 = vpop.eup %3548 }
 0x5b0   : > { %v2399_v59 = vpop.f32.mrf.mxu0 }
 0x5b1   : > { %v3551_v60 = vpop.eup %3550  ;;  %v2453_v1 = vpack.c.bf16 %v2396_v56, %v2392_v54  ;;  %3556 = vtanh.bf16 %v2452_v49  ;;  %v2400_v0 = vadd.f32 %v2399_v59, %v4497_v15 }
 0x5b2   : > { %v2954_v2 = vcombine.low %v3549_v57, %v3551_v60  ;;  %v2955_v5 = vcombine.high %v3549_v57, %v3551_v60  ;;  %v2401_v58 = vpop.f32.mrf.mxu0 }
 0x5b3   : > { %3558 = vtanh.bf16 %v2453_v1  ;;  %v2402_v6 = vadd.f32 %v2401_v58, %v4499_v19 }
 0x5b4   : > { %2672 = vst [vmem:[%s4514_s15 + $0xa0] sm:$0xff] %v2954_v2  ;;  %2673 = vst [vmem:[%s4514_s15 + $0xa8] sm:$0xff] %v2955_v5  ;;  %v2403_v61 = vpop.f32.mrf.mxu0 }
 0x5b5   : > { %v2404_v62 = vadd.f32 %v2403_v61, %v4497_v15 }
 0x5b6   : > { %v2405_v4 = vpop.f32.mrf.mxu0 }
 0x5b7   : > { %v2454_v8 = vpack.c.bf16 %v2404_v62, %v2400_v0  ;;  %v2406_v10 = vadd.f32 %v2405_v4, %v4499_v19  ;;  %v3553_v11 = vpop.eup %3552 }
 0x5b8   : > { %v2409_v14 = vpop.f32.mrf.mxu0 }
 0x5b9   : > { %v3555_v7 = vpop.eup %3554  ;;  %v2455_v12 = vpack.c.bf16 %v2406_v10, %v2402_v6  ;;  %3560 = vtanh.bf16 %v2454_v8  ;;  %v2410_v20 = vadd.f32 %v2409_v14, %v4497_v15 }
 0x5ba   : > { %v2956_v30 = vcombine.low %v3553_v11, %v3555_v7  ;;  %v2957_v17 = vcombine.high %v3553_v11, %v3555_v7  ;;  %v2411_v23 = vpop.f32.mrf.mxu0 }
 0x5bb   : > { %3562 = vtanh.bf16 %v2455_v12  ;;  %v2412_v27 = vadd.f32 %v2411_v23, %v4499_v19 }
 0x5bc   : > { %2674 = vst [vmem:[%s4514_s15 + $0xb0] sm:$0xff] %v2956_v30  ;;  %2675 = vst [vmem:[%s4514_s15 + $0xb8] sm:$0xff] %v2957_v17  ;;  %v2413_v18 = vpop.f32.mrf.mxu0 }
 0x5bd   : > { %v2414_v24 = vadd.f32 %v2413_v18, %v4497_v15 }
 0x5be   : > { %v2415_v22 = vpop.f32.mrf.mxu0 }
 0x5bf   : > { %v2456_v38 = vpack.c.bf16 %v2414_v24, %v2410_v20  ;;  %v2416_v35 = vadd.f32 %v2415_v22, %v4499_v19  ;;  %v3557_v16 = vpop.eup %3556 }
 0x5c0   : > { %v2419_v25 = vpop.f32.mrf.mxu0 }
 0x5c1   : > { %v3559_v26 = vpop.eup %3558  ;;  %v2457_v28 = vpack.c.bf16 %v2416_v35, %v2412_v27  ;;  %3564 = vtanh.bf16 %v2456_v38  ;;  %v2420_v36 = vadd.f32 %v2419_v25, %v4497_v15 }
 0x5c2   : > { %v2958_v31 = vcombine.low %v3557_v16, %v3559_v26  ;;  %v2959_v32 = vcombine.high %v3557_v16, %v3559_v26  ;;  %v2421_v33 = vpop.f32.mrf.mxu0 }
 0x5c3   : > { %3566 = vtanh.bf16 %v2457_v28  ;;  %v2422_v52 = vadd.f32 %v2421_v33, %v4499_v19 }
 0x5c4   : > { %2676 = vst [vmem:[%s4514_s15 + $0xc0] sm:$0xff] %v2958_v31  ;;  %2677 = vst [vmem:[%s4514_s15 + $0xc8] sm:$0xff] %v2959_v32  ;;  %v2423_v34 = vpop.f32.mrf.mxu0 }
 0x5c5   : > { %v2424_v44 = vadd.f32 %v2423_v34, %v4497_v15 }
 0x5c6   : > { %v2425_v47 = vpop.f32.mrf.mxu0 }
 0x5c7   : > { %v2458_v37 = vpack.c.bf16 %v2424_v44, %v2420_v36  ;;  %v2426_v40 = vadd.f32 %v2425_v47, %v4499_v19  ;;  %v3561_v55 = vpop.eup %3560 }
 0x5c9   : > { %v3563_v63 = vpop.eup %3562  ;;  %v2459_v3 = vpack.c.bf16 %v2426_v40, %v2422_v52  ;;  %3568 = vtanh.bf16 %v2458_v37 }
 0x5ca   : > { %v2960_v9 = vcombine.low %v3561_v55, %v3563_v63  ;;  %v2961_v41 = vcombine.high %v3561_v55, %v3563_v63 }
 0x5cb   : > { %3570 = vtanh.bf16 %v2459_v3 }
 0x5cc   : > { %2678 = vst [vmem:[%s4514_s15 + $0xd0] sm:$0xff] %v2960_v9  ;;  %2679 = vst [vmem:[%s4514_s15 + $0xd8] sm:$0xff] %v2961_v41 }
 0x5cf   : > { %v3565_v15 = vpop.eup %3564 }
 0x5d1   : > { %v3567_v42 = vpop.eup %3566 }
 0x5d2   : > { %v2962_v43 = vcombine.low %v3565_v15, %v3567_v42  ;;  %v2963_v45 = vcombine.high %v3565_v15, %v3567_v42 }
 0x5d4   : > { %2680 = vst [vmem:[%s4514_s15 + $0xe0] sm:$0xff] %v2962_v43  ;;  %2681 = vst [vmem:[%s4514_s15 + $0xe8] sm:$0xff] %v2963_v45 }
 0x5d7   : > { %v3569_v19 = vpop.eup %3568 }
 0x5d9   : > { %v3571_v46 = vpop.eup %3570 }
 0x5da   : > { %v2964_v48 = vcombine.low %v3569_v19, %v3571_v46  ;;  %v2965_v50 = vcombine.high %v3569_v19, %v3571_v46 }
 0x5dc   : > { %2682 = vst [vmem:[%s4514_s15 + $0xf0] sm:$0xff] %v2964_v48  ;;  %2683 = vst [vmem:[%s4514_s15 + $0xf8] sm:$0xff] %v2965_v50 }
 0x5dd   : > { %3665 = shalt.err (!%p3662_p12)
}
 0x5de   : > { %s3666_s22 = scalar_lea.hbm %s4603_s9, 4096  ;;  %s3670_s26 = scalar_lea.hbm %s4663_s14, 16384 }
 0x5df   : > { %p3667_p3 = scmp.ne.s32.totalorder %s4603_s9, %s3666_s22  ;;  %p3671_p8 = scmp.lt.s32.totalorder %s4603_s9, %s4663_s14 }
 0x5e0   : > { %p3672_p7 = scmp.lt.s32.totalorder %s3670_s26, %s3666_s22 }
 0x5e1   : > { %p3668_p13 = pnand %p3667_p3, %p4695_p1 }
 0x5e2   : > { %p3673_p10 = por %p3672_p7, %p3671_p8 }
 0x5e3   : > { %p3669_p4 = pneg %p3668_p13 }
 0x5e5   : > { %p3674_p0 = pnand %p3673_p10, %p3669_p4 }
 0x5e7   : > { %3677 = shalt.err (!%p3674_p0)
}
 0x5e8   : > { %s3733_s16 = smov 128   ;;  %s3734_s28 = smov 8  }
 0x5e9   : > { %3378 = dma.vmem_to_hbm [thread:$0]  (%p4695_p1), %s4605_s23, 4096, %s4603_s9, %s2690_s11, %s3733_s16, %s3733_s16, %s3734_s28  }
 0x5ea PF: > { %s4696_s21 = sld [smem:[#allocation14_spill]] }
 0x5eb   : > { %s4697_s17 = sld [smem:[#allocation12_spill]] }
 0x5ec   : > { %s4698_s20 = sld [smem:[#allocation15_spill]] }
 0x5f0   : > { %p3400_p2 = scmp.ge.s32.totalorder %s4696_s21, 2 }
 0x5f1   : > { %s2731_s25 = sand.u32 1, %s4697_s17  }
 0x5f2   : > { %p4699_p6 = scmp.ne.s32.totalorder %s4698_s20, 0  ;;  %s2732_s22 = scalar_lea.sflag [#allocation4], %s2731_s25 }
 0x5f4   : > { %p3392_p11 = pnand %p3400_p2, %p4699_p6 }
 0x5f6   : > { %p3393_p5 = pneg %p3392_p11 }
 0x5f8   : > { %3703 = dma.done.wait (%p3393_p5), %s2732_s22, 4096  }
 0x5f9   : > { %3705 = vsyncadd (%p3393_p5), %s2732_s22, 4294963200  ;;  %s4700_s16 = sld [smem:[#allocation16_spill]]  ;;  %s4703_s29 = smov %s3712_s30 }
 0x5fa   : > { %s4701_s19 = sld [smem:[#allocation13_spill]] }
 0x5fb   : > { %s4702_s15 = sld [smem:[#allocation17_spill]] }
 0x5ff   : > { %p29_p9 = scmp.ge.s32.totalorder %s4700_s16, 6  }
 0x600   : > { %s4704_s30 = smov %s4701_s19 }
 0x601   :  { %31 = sbr.rel (!%p29_p9) target bundleno = 9 (0x9), region = 137 }
 0x606   :  { %2737 = vsyncpa [#allocation3], 1 }
 0x607   :  { %2739 = vsyncpa [#allocation3 + $0x1], 1 }
 0x608   :  { %2740 = vsyncpa [#allocation6], 1 }
 0x609   :  { %2741 = vsyncpa [#allocation4], 1 }
 0x60a   :  { %2743 = vsyncpa [#allocation4 + $0x1], 1 }

</bundles_post_ra>
